<compile_context>
chip_gen: v6e
topology: v6e:2x2x1
jax: 0.10.0
libtpu: 0.0.40
codegen_flags: <defaults>
</compile_context>

<pallas_src>
import functools

import jax
import jax.numpy as jnp
from jax import lax
from jax.experimental import pallas as pl
from jax.experimental.pallas import tpu as pltpu


# ----------------------------- Pallas kernel -------------------------------


def res_down_block_kernel(x_ref, m_ref, w1_ref, w2_ref, wsc_ref, p_ref, o_ref, *, img_w):
    """Channels-major ResDownBlock forward, single step.

    x_ref  : (Cin,  NHW)       channels-major input slab, columns ordered (n, y, x)
    m_ref  : (9, 1, NHW)       per-tap 0/1 boundary masks (reproduce zero padding)
    w1_ref : (9, Cout, Cin)    conv1 per-tap weights, tap t = dy*3 + dx
    w2_ref : (9, Cout, Cout)   conv2 per-tap weights
    wsc_ref: (Cout, Cin)       1x1 shortcut conv weights
    p_ref  : (NHW, NP)         0/0.25 avg-pool matrix, NP = N*H2*W2
    o_ref  : (Cout, NP)        lane-dense output (spatial on the 128-lane minor dim)
    """
    nhw = x_ref.shape[-1]
    cout = w1_ref.shape[1]

    x = x_ref[...].astype(jnp.float32)          # (Cin, NHW) -- shortcut uses this raw
    a1 = jnp.maximum(x, 0.0)                    # first_block=False: activation first

    # ---- conv1: 9 masked, lane-rolled, accumulated matmuls (K = Cin) ----
    h1 = jnp.zeros((cout, nhw), jnp.float32)
    for t in range(9):
        dy, dx = t // 3, t % 3
        off = (dy - 1) * img_w + (dx - 1)       # lane offset of this tap
        tap = a1 if off == 0 else pltpu.roll(a1, (-off) % nhw, axis=1)
        tap = tap * m_ref[t]                    # (Cin, NHW) * (1, NHW) -> zero the halo
        h1 = h1 + jnp.dot(w1_ref[t], tap, preferred_element_type=jnp.float32)

    h1 = jnp.maximum(h1, 0.0)                   # activation between conv1 and conv2

    # ---- conv2: same pattern (K = Cout) ----
    h2 = jnp.zeros((cout, nhw), jnp.float32)
    for t in range(9):
        dy, dx = t // 3, t % 3
        off = (dy - 1) * img_w + (dx - 1)
        tap = h1 if off == 0 else pltpu.roll(h1, (-off) % nhw, axis=1)
        tap = tap * m_ref[t]
        h2 = h2 + jnp.dot(w2_ref[t], tap, preferred_element_type=jnp.float32)

    # ---- shortcut: 1x1 conv on the un-activated input ----
    sc = jnp.dot(wsc_ref[...], x, preferred_element_type=jnp.float32)   # (Cout, NHW)

    # ---- fused 2x2 avg-pool for main path + shortcut: one matmul on the idle MXU ----
    out = jnp.dot(h2 + sc, p_ref[...], preferred_element_type=jnp.float32)  # (Cout, NP)
    o_ref[...] = out.astype(o_ref.dtype)


# ------------------------------ JAX wrapper ---------------------------------


def res_down_block(x_nchw, w1_oihw, w2_oihw, wsc_oihw):
    """x: (N, Cin, H, W); weights already spectrally normalized, PyTorch OIHW layout."""
    N, Cin, H, W = x_nchw.shape
    Cout = w1_oihw.shape[0]
    assert H % 2 == 0 and W % 2 == 0, "2x2 avg-pool assumes even spatial dims"
    H2, W2 = H // 2, W // 2
    NHW, NP = N * H * W, N * H2 * W2

    # Channels-major, lane-dense input slab (Cin, N*H*W), columns ordered (n, y, x).
    # TODO(synk): keep the surrounding model channels-major end-to-end to drop this
    # transpose and the output transpose (the block is latency/overhead-bound).
    x_flat = jnp.transpose(x_nchw, (1, 0, 2, 3)).reshape(Cin, NHW)

    # Per-tap weight matrices: OIHW -> (ky, kx, O, I) -> (9, O, I); 1x1 -> (O, I).
    w1_taps = jnp.transpose(w1_oihw, (2, 3, 0, 1)).reshape(9, Cout, Cin)
    w2_taps = jnp.transpose(w2_oihw, (2, 3, 0, 1)).reshape(9, Cout, Cout)
    wsc_mat = wsc_oihw.reshape(Cout, Cin)

    # Shape-only constants (fold at compile time under jit):
    p_idx = jnp.arange(NHW)
    pn = p_idx // (H * W)
    py = (p_idx // W) % H
    px = p_idx % W

    # Per-tap boundary masks (9, 1, NHW): valid iff the shifted source pixel is in-image.
    mask_list = []
    for dy in range(3):
        for dx in range(3):
            ok = ((py + dy - 1 >= 0) & (py + dy - 1 < H)
                  & (px + dx - 1 >= 0) & (px + dx - 1 < W))
            mask_list.append(ok)
    masks = jnp.stack(mask_list, axis=0).astype(jnp.float32).reshape(9, 1, NHW)

    # 2x2 stride-2 avg-pool as a (NHW, NP) 0/0.25 matrix.
    q_of_p = pn * (H2 * W2) + (py // 2) * W2 + (px // 2)
    pool = (q_of_p[:, None] == jnp.arange(NP)[None, :]).astype(jnp.float32) * 0.25

    kernel = functools.partial(res_down_block_kernel, img_w=W)

    out2d = pl.pallas_call(
        kernel,
        out_shape=jax.ShapeDtypeStruct((Cout, NP), x_nchw.dtype),
        grid_spec=pltpu.PrefetchScalarGridSpec(
            num_scalar_prefetch=0,
            grid=(1,),  # whole problem in one grid step; ~1 MiB of VMEM
            in_specs=[
                pl.BlockSpec((Cin, NHW), lambda i: (0, 0)),
                pl.BlockSpec((9, 1, NHW), lambda i: (0, 0, 0)),
                pl.BlockSpec((9, Cout, Cin), lambda i: (0, 0, 0)),
                pl.BlockSpec((9, Cout, Cout), lambda i: (0, 0, 0)),
                pl.BlockSpec((Cout, Cin), lambda i: (0, 0)),
                pl.BlockSpec((NHW, NP), lambda i: (0, 0)),
            ],
            out_specs=pl.BlockSpec((Cout, NP), lambda i: (0, 0)),
        ),
        compiler_params=pltpu.CompilerParams(dimension_semantics=("arbitrary",)),
    )(x_flat, masks, w1_taps, w2_taps, wsc_mat, pool)

    # (Cout, N*H2*W2) -> (N, Cout, H2, W2)
    return jnp.transpose(out2d.reshape(Cout, N, H2, W2), (1, 0, 2, 3))


# ---------------------- parameter setup (plain JAX glue) --------------------


def spectral_normalize(w_oihw, key, n_power_iterations=1, eps=1e-12):
    """PyTorch-style spectral_norm on the (Cout, Cin*kH*kW) matricized weight."""
    co = w_oihw.shape[0]
    w_mat = w_oihw.reshape(co, -1)
    u = jax.random.normal(key, (co,), dtype=w_oihw.dtype)
    u = u / (jnp.linalg.norm(u) + eps)
    v = None
    for _ in range(n_power_iterations):
        v = w_mat.T @ u
        v = v / (jnp.linalg.norm(v) + eps)
        u = w_mat @ v
        u = u / (jnp.linalg.norm(u) + eps)
    sigma = u @ (w_mat @ v)
    return w_oihw / sigma


# ------------------------------ pure-JAX reference ---------------------------


def reference_forward(x_nchw, w1, w2, wsc):
    dn = ("NCHW", "OIHW", "NCHW")

    def avgpool2(y):
        return lax.reduce_window(y, 0.0, lax.add, (1, 1, 2, 2), (1, 1, 2, 2), "VALID") / 4.0

    h = jax.nn.relu(x_nchw)
    h = lax.conv_general_dilated(h, w1, (1, 1), ((1, 1), (1, 1)), dimension_numbers=dn)
    h = jax.nn.relu(h)
    h = lax.conv_general_dilated(h, w2, (1, 1), ((1, 1), (1, 1)), dimension_numbers=dn)
    h = avgpool2(h)
    sc = lax.conv_general_dilated(x_nchw, wsc, (1, 1), ((0, 0), (0, 0)), dimension_numbers=dn)
    sc = avgpool2(sc)
    return h + sc


# ----------------------------------- main ------------------------------------


if __name__ == "__main__":
    N, Cin, Cout, H, W = 2, 4, 8, 16, 16

    key = jax.random.PRNGKey(0)
    kx, k1, k2, k3, ku1, ku2, ku3 = jax.random.split(key, 7)

    x = jax.random.normal(kx, (N, Cin, H, W), dtype=jnp.float32)

    # Deterministic synthetic weights (PyTorch OIHW layout), then spectral-norm them.
    w1 = 0.1 * jax.random.normal(k1, (Cout, Cin, 3, 3), dtype=jnp.float32)
    w2 = 0.1 * jax.random.normal(k2, (Cout, Cout, 3, 3), dtype=jnp.float32)
    wsc = 0.1 * jax.random.normal(k3, (Cout, Cin, 1, 1), dtype=jnp.float32)
    w1 = spectral_normalize(w1, ku1)
    w2 = spectral_normalize(w2, ku2)
    wsc = spectral_normalize(wsc, ku3)

    out = jax.block_until_ready(res_down_block(x, w1, w2, wsc))
    ref = jax.block_until_ready(reference_forward(x, w1, w2, wsc))

    assert out.shape == (N, Cout, H // 2, W // 2), out.shape
    # f32 everywhere; only accumulation-order / pool-vs-conv ordering differences.
    err = float(jnp.max(jnp.abs(out - ref)))
    assert err < 5e-4, f"max abs error too large: {err}"

    print("KERNEL_OK")
</pallas_src>

<mosaic_0001>
module attributes {stable_mosaic.version = 11 : i64} {
  func.func @res_down_block_kernel(%arg0: i32, %arg1: memref<4x512xf32, #tpu.memory_space<vmem>>, %arg2: memref<9x1x512xf32, #tpu.memory_space<vmem>>, %arg3: memref<9x8x4xf32, #tpu.memory_space<vmem>>, %arg4: memref<9x8x8xf32, #tpu.memory_space<vmem>>, %arg5: memref<8x4xf32, #tpu.memory_space<vmem>>, %arg6: memref<512x128xf32, #tpu.memory_space<vmem>>, %arg7: memref<8x128xf32, #tpu.memory_space<vmem>>) attributes {dimension_semantics = [#tpu.dimension_semantics<arbitrary>], iteration_bounds = array<i64: 1>, scalar_prefetch = 0 : i64, scratch_operands = 0 : i64, tpu.core_type = #tpu.core_type<tc>, window_params = [{pipeline_mode = #tpu.pipeline_mode<synchronous>, transform_indices = @transform_0, window_bounds = array<i64: 4, 512>}, {pipeline_mode = #tpu.pipeline_mode<synchronous>, transform_indices = @transform_1, window_bounds = array<i64: 9, 1, 512>}, {pipeline_mode = #tpu.pipeline_mode<synchronous>, transform_indices = @transform_2, window_bounds = array<i64: 9, 8, 4>}, {pipeline_mode = #tpu.pipeline_mode<synchronous>, transform_indices = @transform_3, window_bounds = array<i64: 9, 8, 8>}, {pipeline_mode = #tpu.pipeline_mode<synchronous>, transform_indices = @transform_4, window_bounds = array<i64: 8, 4>}, {pipeline_mode = #tpu.pipeline_mode<synchronous>, transform_indices = @transform_5, window_bounds = array<i64: 512, 128>}, {pipeline_mode = #tpu.pipeline_mode<synchronous>, transform_indices = @transform_6, window_bounds = array<i64: 8, 128>}]} {
    %c0 = arith.constant 0 : index
    %c0_0 = arith.constant 0 : index
    %0 = vector.load %arg1[%c0, %c0_0] : memref<4x512xf32, #tpu.memory_space<vmem>>, vector<4x512xf32>
    %cst = arith.constant 0.000000e+00 : f32
    %1 = vector.broadcast %cst : f32 to vector<4x512xf32>
    %2 = arith.maximumf %0, %1 : vector<4x512xf32>
    %cst_1 = arith.constant 0.000000e+00 : f32
    %3 = vector.broadcast %cst_1 : f32 to vector<8x512xf32>
    %c17_i32 = arith.constant 17 : i32
    %4 = tpu.dynamic_rotate %2 by %c17_i32 dim 1 : vector<4x512xf32>, i32 -> vector<4x512xf32>
    %c0_2 = arith.constant 0 : index
    %c0_3 = arith.constant 0 : index
    %c0_4 = arith.constant 0 : index
    %5 = vector.load %arg2[%c0_2, %c0_3, %c0_4] : memref<9x1x512xf32, #tpu.memory_space<vmem>>, vector<1x1x512xf32>
    %6 = vector.shape_cast %5 : vector<1x1x512xf32> to vector<1x512xf32>
    %7 = vector.broadcast %6 : vector<1x512xf32> to vector<4x512xf32>
    %8 = arith.mulf %4, %7 : vector<4x512xf32>
    %c0_5 = arith.constant 0 : index
    %c0_6 = arith.constant 0 : index
    %c0_7 = arith.constant 0 : index
    %9 = vector.load %arg3[%c0_5, %c0_6, %c0_7] : memref<9x8x4xf32, #tpu.memory_space<vmem>>, vector<1x8x4xf32>
    %10 = vector.shape_cast %9 : vector<1x8x4xf32> to vector<8x4xf32>
    %cst_8 = arith.constant dense<0.000000e+00> : vector<8x512xf32>
    %11 = tpu.matmul %10, %8, %cst_8 {dimension_numbers = #tpu.dot_dimension_numbers<[1], [0], [0], [1], [0, 0, 1, 1], [], []>} : vector<8x4xf32>, vector<4x512xf32>, vector<8x512xf32> -> vector<8x512xf32>
    %12 = arith.addf %3, %11 : vector<8x512xf32>
    %c16_i32 = arith.constant 16 : i32
    %13 = tpu.dynamic_rotate %2 by %c16_i32 dim 1 : vector<4x512xf32>, i32 -> vector<4x512xf32>
    %c1 = arith.constant 1 : index
    %c0_9 = arith.constant 0 : index
    %c0_10 = arith.constant 0 : index
    %14 = vector.load %arg2[%c1, %c0_9, %c0_10] : memref<9x1x512xf32, #tpu.memory_space<vmem>>, vector<1x1x512xf32>
    %15 = vector.shape_cast %14 : vector<1x1x512xf32> to vector<1x512xf32>
    %16 = vector.broadcast %15 : vector<1x512xf32> to vector<4x512xf32>
    %17 = arith.mulf %13, %16 : vector<4x512xf32>
    %c1_11 = arith.constant 1 : index
    %c0_12 = arith.constant 0 : index
    %c0_13 = arith.constant 0 : index
    %18 = vector.load %arg3[%c1_11, %c0_12, %c0_13] : memref<9x8x4xf32, #tpu.memory_space<vmem>>, vector<1x8x4xf32>
    %19 = vector.shape_cast %18 : vector<1x8x4xf32> to vector<8x4xf32>
    %cst_14 = arith.constant dense<0.000000e+00> : vector<8x512xf32>
    %20 = tpu.matmul %19, %17, %cst_14 {dimension_numbers = #tpu.dot_dimension_numbers<[1], [0], [0], [1], [0, 0, 1, 1], [], []>} : vector<8x4xf32>, vector<4x512xf32>, vector<8x512xf32> -> vector<8x512xf32>
    %21 = arith.addf %12, %20 : vector<8x512xf32>
    %c15_i32 = arith.constant 15 : i32
    %22 = tpu.dynamic_rotate %2 by %c15_i32 dim 1 : vector<4x512xf32>, i32 -> vector<4x512xf32>
    %c2 = arith.constant 2 : index
    %c0_15 = arith.constant 0 : index
    %c0_16 = arith.constant 0 : index
    %23 = vector.load %arg2[%c2, %c0_15, %c0_16] : memref<9x1x512xf32, #tpu.memory_space<vmem>>, vector<1x1x512xf32>
    %24 = vector.shape_cast %23 : vector<1x1x512xf32> to vector<1x512xf32>
    %25 = vector.broadcast %24 : vector<1x512xf32> to vector<4x512xf32>
    %26 = arith.mulf %22, %25 : vector<4x512xf32>
    %c2_17 = arith.constant 2 : index
    %c0_18 = arith.constant 0 : index
    %c0_19 = arith.constant 0 : index
    %27 = vector.load %arg3[%c2_17, %c0_18, %c0_19] : memref<9x8x4xf32, #tpu.memory_space<vmem>>, vector<1x8x4xf32>
    %28 = vector.shape_cast %27 : vector<1x8x4xf32> to vector<8x4xf32>
    %cst_20 = arith.constant dense<0.000000e+00> : vector<8x512xf32>
    %29 = tpu.matmul %28, %26, %cst_20 {dimension_numbers = #tpu.dot_dimension_numbers<[1], [0], [0], [1], [0, 0, 1, 1], [], []>} : vector<8x4xf32>, vector<4x512xf32>, vector<8x512xf32> -> vector<8x512xf32>
    %30 = arith.addf %21, %29 : vector<8x512xf32>
    %c1_i32 = arith.constant 1 : i32
    %31 = tpu.dynamic_rotate %2 by %c1_i32 dim 1 : vector<4x512xf32>, i32 -> vector<4x512xf32>
    %c3 = arith.constant 3 : index
    %c0_21 = arith.constant 0 : index
    %c0_22 = arith.constant 0 : index
    %32 = vector.load %arg2[%c3, %c0_21, %c0_22] : memref<9x1x512xf32, #tpu.memory_space<vmem>>, vector<1x1x512xf32>
    %33 = vector.shape_cast %32 : vector<1x1x512xf32> to vector<1x512xf32>
    %34 = vector.broadcast %33 : vector<1x512xf32> to vector<4x512xf32>
    %35 = arith.mulf %31, %34 : vector<4x512xf32>
    %c3_23 = arith.constant 3 : index
    %c0_24 = arith.constant 0 : index
    %c0_25 = arith.constant 0 : index
    %36 = vector.load %arg3[%c3_23, %c0_24, %c0_25] : memref<9x8x4xf32, #tpu.memory_space<vmem>>, vector<1x8x4xf32>
    %37 = vector.shape_cast %36 : vector<1x8x4xf32> to vector<8x4xf32>
    %cst_26 = arith.constant dense<0.000000e+00> : vector<8x512xf32>
    %38 = tpu.matmul %37, %35, %cst_26 {dimension_numbers = #tpu.dot_dimension_numbers<[1], [0], [0], [1], [0, 0, 1, 1], [], []>} : vector<8x4xf32>, vector<4x512xf32>, vector<8x512xf32> -> vector<8x512xf32>
    %39 = arith.addf %30, %38 : vector<8x512xf32>
    %c4 = arith.constant 4 : index
    %c0_27 = arith.constant 0 : index
    %c0_28 = arith.constant 0 : index
    %40 = vector.load %arg2[%c4, %c0_27, %c0_28] : memref<9x1x512xf32, #tpu.memory_space<vmem>>, vector<1x1x512xf32>
    %41 = vector.shape_cast %40 : vector<1x1x512xf32> to vector<1x512xf32>
    %42 = vector.broadcast %41 : vector<1x512xf32> to vector<4x512xf32>
    %43 = arith.mulf %2, %42 : vector<4x512xf32>
    %c4_29 = arith.constant 4 : index
    %c0_30 = arith.constant 0 : index
    %c0_31 = arith.constant 0 : index
    %44 = vector.load %arg3[%c4_29, %c0_30, %c0_31] : memref<9x8x4xf32, #tpu.memory_space<vmem>>, vector<1x8x4xf32>
    %45 = vector.shape_cast %44 : vector<1x8x4xf32> to vector<8x4xf32>
    %cst_32 = arith.constant dense<0.000000e+00> : vector<8x512xf32>
    %46 = tpu.matmul %45, %43, %cst_32 {dimension_numbers = #tpu.dot_dimension_numbers<[1], [0], [0], [1], [0, 0, 1, 1], [], []>} : vector<8x4xf32>, vector<4x512xf32>, vector<8x512xf32> -> vector<8x512xf32>
    %47 = arith.addf %39, %46 : vector<8x512xf32>
    %c511_i32 = arith.constant 511 : i32
    %48 = tpu.dynamic_rotate %2 by %c511_i32 dim 1 : vector<4x512xf32>, i32 -> vector<4x512xf32>
    %c5 = arith.constant 5 : index
    %c0_33 = arith.constant 0 : index
    %c0_34 = arith.constant 0 : index
    %49 = vector.load %arg2[%c5, %c0_33, %c0_34] : memref<9x1x512xf32, #tpu.memory_space<vmem>>, vector<1x1x512xf32>
    %50 = vector.shape_cast %49 : vector<1x1x512xf32> to vector<1x512xf32>
    %51 = vector.broadcast %50 : vector<1x512xf32> to vector<4x512xf32>
    %52 = arith.mulf %48, %51 : vector<4x512xf32>
    %c5_35 = arith.constant 5 : index
    %c0_36 = arith.constant 0 : index
    %c0_37 = arith.constant 0 : index
    %53 = vector.load %arg3[%c5_35, %c0_36, %c0_37] : memref<9x8x4xf32, #tpu.memory_space<vmem>>, vector<1x8x4xf32>
    %54 = vector.shape_cast %53 : vector<1x8x4xf32> to vector<8x4xf32>
    %cst_38 = arith.constant dense<0.000000e+00> : vector<8x512xf32>
    %55 = tpu.matmul %54, %52, %cst_38 {dimension_numbers = #tpu.dot_dimension_numbers<[1], [0], [0], [1], [0, 0, 1, 1], [], []>} : vector<8x4xf32>, vector<4x512xf32>, vector<8x512xf32> -> vector<8x512xf32>
    %56 = arith.addf %47, %55 : vector<8x512xf32>
    %c497_i32 = arith.constant 497 : i32
    %57 = tpu.dynamic_rotate %2 by %c497_i32 dim 1 : vector<4x512xf32>, i32 -> vector<4x512xf32>
    %c6 = arith.constant 6 : index
    %c0_39 = arith.constant 0 : index
    %c0_40 = arith.constant 0 : index
    %58 = vector.load %arg2[%c6, %c0_39, %c0_40] : memref<9x1x512xf32, #tpu.memory_space<vmem>>, vector<1x1x512xf32>
    %59 = vector.shape_cast %58 : vector<1x1x512xf32> to vector<1x512xf32>
    %60 = vector.broadcast %59 : vector<1x512xf32> to vector<4x512xf32>
    %61 = arith.mulf %57, %60 : vector<4x512xf32>
    %c6_41 = arith.constant 6 : index
    %c0_42 = arith.constant 0 : index
    %c0_43 = arith.constant 0 : index
    %62 = vector.load %arg3[%c6_41, %c0_42, %c0_43] : memref<9x8x4xf32, #tpu.memory_space<vmem>>, vector<1x8x4xf32>
    %63 = vector.shape_cast %62 : vector<1x8x4xf32> to vector<8x4xf32>
    %cst_44 = arith.constant dense<0.000000e+00> : vector<8x512xf32>
    %64 = tpu.matmul %63, %61, %cst_44 {dimension_numbers = #tpu.dot_dimension_numbers<[1], [0], [0], [1], [0, 0, 1, 1], [], []>} : vector<8x4xf32>, vector<4x512xf32>, vector<8x512xf32> -> vector<8x512xf32>
    %65 = arith.addf %56, %64 : vector<8x512xf32>
    %c496_i32 = arith.constant 496 : i32
    %66 = tpu.dynamic_rotate %2 by %c496_i32 dim 1 : vector<4x512xf32>, i32 -> vector<4x512xf32>
    %c7 = arith.constant 7 : index
    %c0_45 = arith.constant 0 : index
    %c0_46 = arith.constant 0 : index
    %67 = vector.load %arg2[%c7, %c0_45, %c0_46] : memref<9x1x512xf32, #tpu.memory_space<vmem>>, vector<1x1x512xf32>
    %68 = vector.shape_cast %67 : vector<1x1x512xf32> to vector<1x512xf32>
    %69 = vector.broadcast %68 : vector<1x512xf32> to vector<4x512xf32>
    %70 = arith.mulf %66, %69 : vector<4x512xf32>
    %c7_47 = arith.constant 7 : index
    %c0_48 = arith.constant 0 : index
    %c0_49 = arith.constant 0 : index
    %71 = vector.load %arg3[%c7_47, %c0_48, %c0_49] : memref<9x8x4xf32, #tpu.memory_space<vmem>>, vector<1x8x4xf32>
    %72 = vector.shape_cast %71 : vector<1x8x4xf32> to vector<8x4xf32>
    %cst_50 = arith.constant dense<0.000000e+00> : vector<8x512xf32>
    %73 = tpu.matmul %72, %70, %cst_50 {dimension_numbers = #tpu.dot_dimension_numbers<[1], [0], [0], [1], [0, 0, 1, 1], [], []>} : vector<8x4xf32>, vector<4x512xf32>, vector<8x512xf32> -> vector<8x512xf32>
    %74 = arith.addf %65, %73 : vector<8x512xf32>
    %c495_i32 = arith.constant 495 : i32
    %75 = tpu.dynamic_rotate %2 by %c495_i32 dim 1 : vector<4x512xf32>, i32 -> vector<4x512xf32>
    %c8 = arith.constant 8 : index
    %c0_51 = arith.constant 0 : index
    %c0_52 = arith.constant 0 : index
    %76 = vector.load %arg2[%c8, %c0_51, %c0_52] : memref<9x1x512xf32, #tpu.memory_space<vmem>>, vector<1x1x512xf32>
    %77 = vector.shape_cast %76 : vector<1x1x512xf32> to vector<1x512xf32>
    %78 = vector.broadcast %77 : vector<1x512xf32> to vector<4x512xf32>
    %79 = arith.mulf %75, %78 : vector<4x512xf32>
    %c8_53 = arith.constant 8 : index
    %c0_54 = arith.constant 0 : index
    %c0_55 = arith.constant 0 : index
    %80 = vector.load %arg3[%c8_53, %c0_54, %c0_55] : memref<9x8x4xf32, #tpu.memory_space<vmem>>, vector<1x8x4xf32>
    %81 = vector.shape_cast %80 : vector<1x8x4xf32> to vector<8x4xf32>
    %cst_56 = arith.constant dense<0.000000e+00> : vector<8x512xf32>
    %82 = tpu.matmul %81, %79, %cst_56 {dimension_numbers = #tpu.dot_dimension_numbers<[1], [0], [0], [1], [0, 0, 1, 1], [], []>} : vector<8x4xf32>, vector<4x512xf32>, vector<8x512xf32> -> vector<8x512xf32>
    %83 = arith.addf %74, %82 : vector<8x512xf32>
    %cst_57 = arith.constant 0.000000e+00 : f32
    %84 = vector.broadcast %cst_57 : f32 to vector<8x512xf32>
    %85 = arith.maximumf %83, %84 : vector<8x512xf32>
    %cst_58 = arith.constant 0.000000e+00 : f32
    %86 = vector.broadcast %cst_58 : f32 to vector<8x512xf32>
    %c17_i32_59 = arith.constant 17 : i32
    %87 = tpu.dynamic_rotate %85 by %c17_i32_59 dim 1 : vector<8x512xf32>, i32 -> vector<8x512xf32>
    %c0_60 = arith.constant 0 : index
    %c0_61 = arith.constant 0 : index
    %c0_62 = arith.constant 0 : index
    %88 = vector.load %arg2[%c0_60, %c0_61, %c0_62] : memref<9x1x512xf32, #tpu.memory_space<vmem>>, vector<1x1x512xf32>
    %89 = vector.shape_cast %88 : vector<1x1x512xf32> to vector<1x512xf32>
    %90 = vector.broadcast %89 : vector<1x512xf32> to vector<8x512xf32>
    %91 = arith.mulf %87, %90 : vector<8x512xf32>
    %c0_63 = arith.constant 0 : index
    %c0_64 = arith.constant 0 : index
    %c0_65 = arith.constant 0 : index
    %92 = vector.load %arg4[%c0_63, %c0_64, %c0_65] : memref<9x8x8xf32, #tpu.memory_space<vmem>>, vector<1x8x8xf32>
    %93 = vector.shape_cast %92 : vector<1x8x8xf32> to vector<8x8xf32>
    %cst_66 = arith.constant dense<0.000000e+00> : vector<8x512xf32>
    %94 = tpu.matmul %93, %91, %cst_66 {dimension_numbers = #tpu.dot_dimension_numbers<[1], [0], [0], [1], [0, 0, 1, 1], [], []>} : vector<8x8xf32>, vector<8x512xf32>, vector<8x512xf32> -> vector<8x512xf32>
    %95 = arith.addf %86, %94 : vector<8x512xf32>
    %c16_i32_67 = arith.constant 16 : i32
    %96 = tpu.dynamic_rotate %85 by %c16_i32_67 dim 1 : vector<8x512xf32>, i32 -> vector<8x512xf32>
    %c1_68 = arith.constant 1 : index
    %c0_69 = arith.constant 0 : index
    %c0_70 = arith.constant 0 : index
    %97 = vector.load %arg2[%c1_68, %c0_69, %c0_70] : memref<9x1x512xf32, #tpu.memory_space<vmem>>, vector<1x1x512xf32>
    %98 = vector.shape_cast %97 : vector<1x1x512xf32> to vector<1x512xf32>
    %99 = vector.broadcast %98 : vector<1x512xf32> to vector<8x512xf32>
    %100 = arith.mulf %96, %99 : vector<8x512xf32>
    %c1_71 = arith.constant 1 : index
    %c0_72 = arith.constant 0 : index
    %c0_73 = arith.constant 0 : index
    %101 = vector.load %arg4[%c1_71, %c0_72, %c0_73] : memref<9x8x8xf32, #tpu.memory_space<vmem>>, vector<1x8x8xf32>
    %102 = vector.shape_cast %101 : vector<1x8x8xf32> to vector<8x8xf32>
    %cst_74 = arith.constant dense<0.000000e+00> : vector<8x512xf32>
    %103 = tpu.matmul %102, %100, %cst_74 {dimension_numbers = #tpu.dot_dimension_numbers<[1], [0], [0], [1], [0, 0, 1, 1], [], []>} : vector<8x8xf32>, vector<8x512xf32>, vector<8x512xf32> -> vector<8x512xf32>
    %104 = arith.addf %95, %103 : vector<8x512xf32>
    %c15_i32_75 = arith.constant 15 : i32
    %105 = tpu.dynamic_rotate %85 by %c15_i32_75 dim 1 : vector<8x512xf32>, i32 -> vector<8x512xf32>
    %c2_76 = arith.constant 2 : index
    %c0_77 = arith.constant 0 : index
    %c0_78 = arith.constant 0 : index
    %106 = vector.load %arg2[%c2_76, %c0_77, %c0_78] : memref<9x1x512xf32, #tpu.memory_space<vmem>>, vector<1x1x512xf32>
    %107 = vector.shape_cast %106 : vector<1x1x512xf32> to vector<1x512xf32>
    %108 = vector.broadcast %107 : vector<1x512xf32> to vector<8x512xf32>
    %109 = arith.mulf %105, %108 : vector<8x512xf32>
    %c2_79 = arith.constant 2 : index
    %c0_80 = arith.constant 0 : index
    %c0_81 = arith.constant 0 : index
    %110 = vector.load %arg4[%c2_79, %c0_80, %c0_81] : memref<9x8x8xf32, #tpu.memory_space<vmem>>, vector<1x8x8xf32>
    %111 = vector.shape_cast %110 : vector<1x8x8xf32> to vector<8x8xf32>
    %cst_82 = arith.constant dense<0.000000e+00> : vector<8x512xf32>
    %112 = tpu.matmul %111, %109, %cst_82 {dimension_numbers = #tpu.dot_dimension_numbers<[1], [0], [0], [1], [0, 0, 1, 1], [], []>} : vector<8x8xf32>, vector<8x512xf32>, vector<8x512xf32> -> vector<8x512xf32>
    %113 = arith.addf %104, %112 : vector<8x512xf32>
    %c1_i32_83 = arith.constant 1 : i32
    %114 = tpu.dynamic_rotate %85 by %c1_i32_83 dim 1 : vector<8x512xf32>, i32 -> vector<8x512xf32>
    %c3_84 = arith.constant 3 : index
    %c0_85 = arith.constant 0 : index
    %c0_86 = arith.constant 0 : index
    %115 = vector.load %arg2[%c3_84, %c0_85, %c0_86] : memref<9x1x512xf32, #tpu.memory_space<vmem>>, vector<1x1x512xf32>
    %116 = vector.shape_cast %115 : vector<1x1x512xf32> to vector<1x512xf32>
    %117 = vector.broadcast %116 : vector<1x512xf32> to vector<8x512xf32>
    %118 = arith.mulf %114, %117 : vector<8x512xf32>
    %c3_87 = arith.constant 3 : index
    %c0_88 = arith.constant 0 : index
    %c0_89 = arith.constant 0 : index
    %119 = vector.load %arg4[%c3_87, %c0_88, %c0_89] : memref<9x8x8xf32, #tpu.memory_space<vmem>>, vector<1x8x8xf32>
    %120 = vector.shape_cast %119 : vector<1x8x8xf32> to vector<8x8xf32>
    %cst_90 = arith.constant dense<0.000000e+00> : vector<8x512xf32>
    %121 = tpu.matmul %120, %118, %cst_90 {dimension_numbers = #tpu.dot_dimension_numbers<[1], [0], [0], [1], [0, 0, 1, 1], [], []>} : vector<8x8xf32>, vector<8x512xf32>, vector<8x512xf32> -> vector<8x512xf32>
    %122 = arith.addf %113, %121 : vector<8x512xf32>
    %c4_91 = arith.constant 4 : index
    %c0_92 = arith.constant 0 : index
    %c0_93 = arith.constant 0 : index
    %123 = vector.load %arg2[%c4_91, %c0_92, %c0_93] : memref<9x1x512xf32, #tpu.memory_space<vmem>>, vector<1x1x512xf32>
    %124 = vector.shape_cast %123 : vector<1x1x512xf32> to vector<1x512xf32>
    %125 = vector.broadcast %124 : vector<1x512xf32> to vector<8x512xf32>
    %126 = arith.mulf %85, %125 : vector<8x512xf32>
    %c4_94 = arith.constant 4 : index
    %c0_95 = arith.constant 0 : index
    %c0_96 = arith.constant 0 : index
    %127 = vector.load %arg4[%c4_94, %c0_95, %c0_96] : memref<9x8x8xf32, #tpu.memory_space<vmem>>, vector<1x8x8xf32>
    %128 = vector.shape_cast %127 : vector<1x8x8xf32> to vector<8x8xf32>
    %cst_97 = arith.constant dense<0.000000e+00> : vector<8x512xf32>
    %129 = tpu.matmul %128, %126, %cst_97 {dimension_numbers = #tpu.dot_dimension_numbers<[1], [0], [0], [1], [0, 0, 1, 1], [], []>} : vector<8x8xf32>, vector<8x512xf32>, vector<8x512xf32> -> vector<8x512xf32>
    %130 = arith.addf %122, %129 : vector<8x512xf32>
    %c511_i32_98 = arith.constant 511 : i32
    %131 = tpu.dynamic_rotate %85 by %c511_i32_98 dim 1 : vector<8x512xf32>, i32 -> vector<8x512xf32>
    %c5_99 = arith.constant 5 : index
    %c0_100 = arith.constant 0 : index
    %c0_101 = arith.constant 0 : index
    %132 = vector.load %arg2[%c5_99, %c0_100, %c0_101] : memref<9x1x512xf32, #tpu.memory_space<vmem>>, vector<1x1x512xf32>
    %133 = vector.shape_cast %132 : vector<1x1x512xf32> to vector<1x512xf32>
    %134 = vector.broadcast %133 : vector<1x512xf32> to vector<8x512xf32>
    %135 = arith.mulf %131, %134 : vector<8x512xf32>
    %c5_102 = arith.constant 5 : index
    %c0_103 = arith.constant 0 : index
    %c0_104 = arith.constant 0 : index
    %136 = vector.load %arg4[%c5_102, %c0_103, %c0_104] : memref<9x8x8xf32, #tpu.memory_space<vmem>>, vector<1x8x8xf32>
    %137 = vector.shape_cast %136 : vector<1x8x8xf32> to vector<8x8xf32>
    %cst_105 = arith.constant dense<0.000000e+00> : vector<8x512xf32>
    %138 = tpu.matmul %137, %135, %cst_105 {dimension_numbers = #tpu.dot_dimension_numbers<[1], [0], [0], [1], [0, 0, 1, 1], [], []>} : vector<8x8xf32>, vector<8x512xf32>, vector<8x512xf32> -> vector<8x512xf32>
    %139 = arith.addf %130, %138 : vector<8x512xf32>
    %c497_i32_106 = arith.constant 497 : i32
    %140 = tpu.dynamic_rotate %85 by %c497_i32_106 dim 1 : vector<8x512xf32>, i32 -> vector<8x512xf32>
    %c6_107 = arith.constant 6 : index
    %c0_108 = arith.constant 0 : index
    %c0_109 = arith.constant 0 : index
    %141 = vector.load %arg2[%c6_107, %c0_108, %c0_109] : memref<9x1x512xf32, #tpu.memory_space<vmem>>, vector<1x1x512xf32>
    %142 = vector.shape_cast %141 : vector<1x1x512xf32> to vector<1x512xf32>
    %143 = vector.broadcast %142 : vector<1x512xf32> to vector<8x512xf32>
    %144 = arith.mulf %140, %143 : vector<8x512xf32>
    %c6_110 = arith.constant 6 : index
    %c0_111 = arith.constant 0 : index
    %c0_112 = arith.constant 0 : index
    %145 = vector.load %arg4[%c6_110, %c0_111, %c0_112] : memref<9x8x8xf32, #tpu.memory_space<vmem>>, vector<1x8x8xf32>
    %146 = vector.shape_cast %145 : vector<1x8x8xf32> to vector<8x8xf32>
    %cst_113 = arith.constant dense<0.000000e+00> : vector<8x512xf32>
    %147 = tpu.matmul %146, %144, %cst_113 {dimension_numbers = #tpu.dot_dimension_numbers<[1], [0], [0], [1], [0, 0, 1, 1], [], []>} : vector<8x8xf32>, vector<8x512xf32>, vector<8x512xf32> -> vector<8x512xf32>
    %148 = arith.addf %139, %147 : vector<8x512xf32>
    %c496_i32_114 = arith.constant 496 : i32
    %149 = tpu.dynamic_rotate %85 by %c496_i32_114 dim 1 : vector<8x512xf32>, i32 -> vector<8x512xf32>
    %c7_115 = arith.constant 7 : index
    %c0_116 = arith.constant 0 : index
    %c0_117 = arith.constant 0 : index
    %150 = vector.load %arg2[%c7_115, %c0_116, %c0_117] : memref<9x1x512xf32, #tpu.memory_space<vmem>>, vector<1x1x512xf32>
    %151 = vector.shape_cast %150 : vector<1x1x512xf32> to vector<1x512xf32>
    %152 = vector.broadcast %151 : vector<1x512xf32> to vector<8x512xf32>
    %153 = arith.mulf %149, %152 : vector<8x512xf32>
    %c7_118 = arith.constant 7 : index
    %c0_119 = arith.constant 0 : index
    %c0_120 = arith.constant 0 : index
    %154 = vector.load %arg4[%c7_118, %c0_119, %c0_120] : memref<9x8x8xf32, #tpu.memory_space<vmem>>, vector<1x8x8xf32>
    %155 = vector.shape_cast %154 : vector<1x8x8xf32> to vector<8x8xf32>
    %cst_121 = arith.constant dense<0.000000e+00> : vector<8x512xf32>
    %156 = tpu.matmul %155, %153, %cst_121 {dimension_numbers = #tpu.dot_dimension_numbers<[1], [0], [0], [1], [0, 0, 1, 1], [], []>} : vector<8x8xf32>, vector<8x512xf32>, vector<8x512xf32> -> vector<8x512xf32>
    %157 = arith.addf %148, %156 : vector<8x512xf32>
    %c495_i32_122 = arith.constant 495 : i32
    %158 = tpu.dynamic_rotate %85 by %c495_i32_122 dim 1 : vector<8x512xf32>, i32 -> vector<8x512xf32>
    %c8_123 = arith.constant 8 : index
    %c0_124 = arith.constant 0 : index
    %c0_125 = arith.constant 0 : index
    %159 = vector.load %arg2[%c8_123, %c0_124, %c0_125] : memref<9x1x512xf32, #tpu.memory_space<vmem>>, vector<1x1x512xf32>
    %160 = vector.shape_cast %159 : vector<1x1x512xf32> to vector<1x512xf32>
    %161 = vector.broadcast %160 : vector<1x512xf32> to vector<8x512xf32>
    %162 = arith.mulf %158, %161 : vector<8x512xf32>
    %c8_126 = arith.constant 8 : index
    %c0_127 = arith.constant 0 : index
    %c0_128 = arith.constant 0 : index
    %163 = vector.load %arg4[%c8_126, %c0_127, %c0_128] : memref<9x8x8xf32, #tpu.memory_space<vmem>>, vector<1x8x8xf32>
    %164 = vector.shape_cast %163 : vector<1x8x8xf32> to vector<8x8xf32>
    %cst_129 = arith.constant dense<0.000000e+00> : vector<8x512xf32>
    %165 = tpu.matmul %164, %162, %cst_129 {dimension_numbers = #tpu.dot_dimension_numbers<[1], [0], [0], [1], [0, 0, 1, 1], [], []>} : vector<8x8xf32>, vector<8x512xf32>, vector<8x512xf32> -> vector<8x512xf32>
    %166 = arith.addf %157, %165 : vector<8x512xf32>
    %c0_130 = arith.constant 0 : index
    %c0_131 = arith.constant 0 : index
    %167 = vector.load %arg5[%c0_130, %c0_131] : memref<8x4xf32, #tpu.memory_space<vmem>>, vector<8x4xf32>
    %cst_132 = arith.constant dense<0.000000e+00> : vector<8x512xf32>
    %168 = tpu.matmul %167, %0, %cst_132 {dimension_numbers = #tpu.dot_dimension_numbers<[1], [0], [0], [1], [0, 0, 1, 1], [], []>} : vector<8x4xf32>, vector<4x512xf32>, vector<8x512xf32> -> vector<8x512xf32>
    %169 = arith.addf %166, %168 : vector<8x512xf32>
    %c0_133 = arith.constant 0 : index
    %c0_134 = arith.constant 0 : index
    %170 = vector.load %arg6[%c0_133, %c0_134] : memref<512x128xf32, #tpu.memory_space<vmem>>, vector<512x128xf32>
    %cst_135 = arith.constant dense<0.000000e+00> : vector<8x128xf32>
    %171 = tpu.matmul %169, %170, %cst_135 {dimension_numbers = #tpu.dot_dimension_numbers<[1], [0], [0], [1], [0, 0, 1, 1], [], []>} : vector<8x512xf32>, vector<512x128xf32>, vector<8x128xf32> -> vector<8x128xf32>
    %c0_136 = arith.constant 0 : index
    %c0_137 = arith.constant 0 : index
    %172 = vector.load %arg7[%c0_136, %c0_137] : memref<8x128xf32, #tpu.memory_space<vmem>>, vector<8x128xf32>
    tpu.vector_store %arg7[%c0_136, %c0_137], %171 {strides = array<i32>} : memref<8x128xf32, #tpu.memory_space<vmem>>, vector<8x128xf32>,
    return
  }
  func.func @transform_0(%arg0: i32) -> (i32, i32) {
    %c0_i32 = arith.constant 0 : i32
    %c0_i32_0 = arith.constant 0 : i32
    %c0_i32_1 = arith.constant 0 : i32
    return %c0_i32, %c0_i32_0 : i32, i32
  }
  func.func @transform_1(%arg0: i32) -> (i32, i32, i32) {
    %c0_i32 = arith.constant 0 : i32
    %c0_i32_0 = arith.constant 0 : i32
    %c0_i32_1 = arith.constant 0 : i32
    %c0_i32_2 = arith.constant 0 : i32
    return %c0_i32, %c0_i32_0, %c0_i32_1 : i32, i32, i32
  }
  func.func @transform_2(%arg0: i32) -> (i32, i32, i32) {
    %c0_i32 = arith.constant 0 : i32
    %c0_i32_0 = arith.constant 0 : i32
    %c0_i32_1 = arith.constant 0 : i32
    %c0_i32_2 = arith.constant 0 : i32
    return %c0_i32, %c0_i32_0, %c0_i32_1 : i32, i32, i32
  }
  func.func @transform_3(%arg0: i32) -> (i32, i32, i32) {
    %c0_i32 = arith.constant 0 : i32
    %c0_i32_0 = arith.constant 0 : i32
    %c0_i32_1 = arith.constant 0 : i32
    %c0_i32_2 = arith.constant 0 : i32
    return %c0_i32, %c0_i32_0, %c0_i32_1 : i32, i32, i32
  }
  func.func @transform_4(%arg0: i32) -> (i32, i32) {
    %c0_i32 = arith.constant 0 : i32
    %c0_i32_0 = arith.constant 0 : i32
    %c0_i32_1 = arith.constant 0 : i32
    return %c0_i32, %c0_i32_0 : i32, i32
  }
  func.func @transform_5(%arg0: i32) -> (i32, i32) {
    %c0_i32 = arith.constant 0 : i32
    %c0_i32_0 = arith.constant 0 : i32
    %c0_i32_1 = arith.constant 0 : i32
    return %c0_i32, %c0_i32_0 : i32, i32
  }
  func.func @transform_6(%arg0: i32) -> (i32, i32) {
    %c0_i32 = arith.constant 0 : i32
    %c0_i32_0 = arith.constant 0 : i32
    %c0_i32_1 = arith.constant 0 : i32
    return %c0_i32, %c0_i32_0 : i32, i32
  }
}

</mosaic_0001>

<bundles_post_ra>
// kernel: tpu_custom_call.1
= control target key start
LH: loop header
LB: loop body
LE: loop exit
PB: predicated region body
PF: predicated region fallthrough
CT: control target
= control target key end

     0   :  { %11 = vsyncpa [#allocation3], 0  ;;  %s4686_s0 = inlined_call_operand.vmem [shape: f32[4,512], index: 0, kind: input, shape index: {}]   ;;  %s4687_s1 = inlined_call_operand.vmem [shape: f32[9,1,512], index: 1, kind: input, shape index: {}]   ;;  %s4688_s2 = inlined_call_operand.vmem [shape: f32[9,8,4], index: 2, kind: input, shape index: {}]   ;;  %s4689_s3 = inlined_call_operand.vmem [shape: f32[9,8,8], index: 3, kind: input, shape index: {}]   ;;  %s4690_s4 = inlined_call_operand.vmem [shape: f32[8,4], index: 4, kind: input, shape index: {}]   ;;  %s4691_s5 = inlined_call_operand.hbm [shape: f32[512,128], index: 5, kind: input, shape index: {}]   ;;  %s4692_s6 = inlined_call_operand.hbm [shape: f32[8,128], index: 6, kind: output, shape index: {}]  }
   0x1   :  { %12 = vsyncpa [#allocation4], 0  ;;  %s3960_s21 = smov [#allocation2]  }
   0x2   :  { %s28_s22 = sshll.u32 %s3960_s21, 4  ;;  %s29_s22 = int_to_ptr.vmem [resolvable:$true] %s28_s22 }
   0x3   :  { %s3924_s23 = scalar_lea.vmem %s29_s22, 8192  ;;  %p3929_p1 = scmp.lt.s32.totalorder %s29_s22, %s29_s22 }
   0x4   :  { %p3925_p0 = scmp.ne.s32.totalorder %s29_s22, %s3924_s23  ;;  %p3930_p2 = scmp.lt.s32.totalorder %s3924_s23, %s3924_s23 }
   0x6   :  { %p3931_p3 = por %p3930_p2, %p3929_p1 }
   0x8   :  { %p3932_p4 = pnand %p3931_p3, %p3925_p0 }
   0xa   :  { %3935 = shalt.err (!%p3932_p4)
}
   0xb   :  { %s3961_s24 = smov 128   ;;  %s3962_s25 = smov 8  }
   0xc   :  { %34 = dma.hbm_to_vmem [thread:$0]  %s4691_s5, 8192, %s29_s22, [#allocation3], %s3961_s24, %s3961_s24, %s3962_s25  }
   0xd   :  { %3956 = dma.done.wait [#allocation3], 8192  }
   0xe   :  { %3957 = vsyncadd [#allocation3], 4294959104  ;;  %v39_v0 = vld [vmem:[%s4686_s0 + $0x8] sm:$0xff]  ;;  %v38_v1 = vld [vmem:[%s4686_s0] sm:$0xff]  ;;  %s3963_s8 = smov 16   ;;  %v4693_v5 = vmov 0.0   ;;  %v56_v7 = vlaneseq }
   0xf   :  { %v4017_v2 = vmax.f32 %v39_v0, 0.0  ;;  %v4019_v3 = vmax.f32 %v38_v1, 0.0  ;;  %284 = vmatprep.mubr.f32.mxu1 %v4693_v5  ;;  %213 = vmatprep.mubr.f32.mxu0 %v4693_v5  ;;  %s3965_s5 = smov 17   ;;  %s3966_s9 = smov 15   ;;  %v3727_v11 = vld [vmem:[%s4687_s1 + $0x4] sm:$0xf] }
  0x10   :  { %s3967_s10 = smov 1   ;;  %s3968_s11 = smov 127   ;;  %v66_v8 = vshrl.u32 %v56_v7, 7  ;;  %v4075_v9 = vand.u32 127, %v56_v7  ;;  %vm136_vm1 = vcmask 1043456   ;;  %v3728_v48 = vld [vmem:[%s4688_s2 + $0x8] sm:$0xff] }
  0x11   :  { %94 = vrot.lane.b32.xlu1 %v4017_v2, %s3963_s8  ;;  %90 = vrot.lane.b32.xlu0 %v4019_v3, %s3963_s8  ;;  %v45_v4 = vcombine.high %v4017_v2, %v4017_v2  ;;  %v44_v6 = vcombine.high %v4019_v3, %v4019_v3  ;;  %s3969_s12 = smov 113   ;;  %s3970_s13 = smov 112   ;;  %v63_v23 = vld [vmem:[%s4687_s1] sm:$0xf]  ;;  %v3741_v25 = vld [vmem:[%s4687_s1 + $0x8] sm:$0xf] }
  0x12   :  { %s3971_s14 = smov 111   ;;  %v4077_v10 = vsub.s32 3, %v66_v8  ;;  %vm98_vm0 = vcmp.lt.s32.totalorder %v4075_v9, 16  ;;  %v4089_v19 = vsub.s32 0, %v66_v8  ;;  %v4091_v20 = vsub.s32 1, %v66_v8  ;;  %v89_v62 = vld [vmem:[%s4688_s2] sm:$0xff] }
  0x13   :  { %v4093_v21 = vsub.s32 2, %v66_v8  ;;  %vm58_vm2 = vcmp.lt.s32.totalorder %v4075_v9, 17  ;;  %vm456_vm3 = vcmp.lt.s32.totalorder %v4075_v9, 15  ;;  %v3757_v45 = vld [vmem:[%s4687_s1 + $0x10] sm:$0xf]  ;;  %vm132_vm4 = vcmask 31744  }
  0x14   :  { %v4084_v14 = vrot.slane %v3727_v11, %v4077_v10  ;;  %v4104_v26 = vrot.slane %v63_v23, %v4077_v10  ;;  %v4110_v28 = vrot.slane %v3727_v11, %v4091_v20  ;;  %v4113_v29 = vrot.slane %v3727_v11, %v4089_v19  ;;  %v3749_v57 = vld [vmem:[%s4687_s1 + $0xc] sm:$0xf] }
  0x15   :  { %96 = vrot.lane.b32.xlu1 %v45_v4, %s3963_s8  ;;  %48 = vrot.lane.b32.xlu0 %v4019_v3, %s3965_s5  ;;  %v4107_v27 = vrot.slane %v3727_v11, %v4093_v21  ;;  %v4116_v30 = vrot.slane %v63_v23, %v4091_v20  ;;  %v4119_v31 = vrot.slane %v63_v23, %v4093_v21  ;;  %vm659_vm5 = vcmp.lt.s32.totalorder %v4075_v9, 1 }
  0x16   :  { %v4124_v33 = vrot.slane %v63_v23, %v4089_v19  ;;  %v4128_v36 = vrot.slane %v3741_v25, %v4091_v20  ;;  %v4153_v49 = vrot.slane %v3741_v25, %v4089_v19  ;;  %v4159_v53 = vrot.slane %v3741_v25, %v4093_v21 }
  0x17   :  { %v4162_v54 = vrot.slane %v3741_v25, %v4077_v10  ;;  %v4173_v58 = vrot.slane %v3757_v45, %v4089_v19  ;;  %v4180_v61 = vrot.slane %v3757_v45, %v4091_v20  ;;  %v4190_v1 = vrot.slane %v3749_v57, %v4091_v20 }
  0x18   :  { %v4226_v25 = vrot.slane %v3749_v57, %v4089_v19  ;;  %vm1050_vm6 = vcmp.lt.s32.totalorder %v4075_v9, 127  ;;  %vm1253_vm7 = vcmp.lt.s32.totalorder %v4075_v9, 113  ;;  %vm1456_vm8 = vcmp.lt.s32.totalorder %v4075_v9, 112 }
  0x19   :  { %52 = vrot.lane.b32.xlu0 %v4017_v2, %s3965_s5  ;;  %50 = vrot.lane.b32.xlu1 %v44_v6, %s3965_s5  ;;  %vm1659_vm9 = vcmp.lt.s32.totalorder %v4075_v9, 111  ;;  %vm1893_vm10 = vcmask 64512   ;;  %v3915_v9 = vld [vmem:[%s4686_s0 + $0x8] sm:$0xff] }
  0x1d   :  { %54 = vrot.lane.b32.xlu1 %v45_v4, %s3965_s5  ;;  %92 = vrot.lane.b32.xlu0 %v44_v6, %s3963_s8 }
  0x21   :  { %450 = vrot.lane.b32.xlu1 %v44_v6, %s3966_s9  ;;  %448 = vrot.lane.b32.xlu0 %v4019_v3, %s3966_s9 }
  0x25   :  { %454 = vrot.lane.b32.xlu1 %v45_v4, %s3966_s9  ;;  %452 = vrot.lane.b32.xlu0 %v4017_v2, %s3966_s9 }
  0x29   :  { %653 = vrot.lane.b32.xlu1 %v44_v6, %s3967_s10  ;;  %651 = vrot.lane.b32.xlu0 %v4019_v3, %s3967_s10 }
  0x2d   :  { %657 = vrot.lane.b32.xlu1 %v45_v4, %s3967_s10  ;;  %655 = vrot.lane.b32.xlu0 %v4017_v2, %s3967_s10 }
  0x31   :  { %1044 = vrot.lane.b32.xlu1 %v44_v6, %s3968_s11  ;;  %1042 = vrot.lane.b32.xlu0 %v4019_v3, %s3968_s11 }
  0x35   :  { %1048 = vrot.lane.b32.xlu1 %v45_v4, %s3968_s11  ;;  %1046 = vrot.lane.b32.xlu0 %v4017_v2, %s3968_s11 }
  0x39   :  { %1247 = vrot.lane.b32.xlu1 %v44_v6, %s3969_s12  ;;  %1245 = vrot.lane.b32.xlu0 %v4019_v3, %s3969_s12 }
  0x3d   :  { %1251 = vrot.lane.b32.xlu1 %v45_v4, %s3969_s12  ;;  %1249 = vrot.lane.b32.xlu0 %v4017_v2, %s3969_s12 }
  0x41   :  { %1450 = vrot.lane.b32.xlu1 %v44_v6, %s3970_s13  ;;  %1448 = vrot.lane.b32.xlu0 %v4019_v3, %s3970_s13 }
  0x45   :  { %1454 = vrot.lane.b32.xlu1 %v45_v4, %s3970_s13  ;;  %1452 = vrot.lane.b32.xlu0 %v4017_v2, %s3970_s13 }
  0x49   :  { %1653 = vrot.lane.b32.xlu1 %v44_v6, %s3971_s14  ;;  %1651 = vrot.lane.b32.xlu0 %v4019_v3, %s3971_s14  ;;  %v4196_v6 = vrot.slane %v3757_v45, %v4077_v10 }
  0x4d   :  { %1657 = vrot.lane.b32.xlu1 %v45_v4, %s3971_s14  ;;  %1655 = vrot.lane.b32.xlu0 %v4017_v2, %s3971_s14  ;;  %v4193_v4 = vrot.slane %v3757_v45, %v4093_v21 }
  0x4f   :  { %v874_v23 = vcombine.low %v4193_v4, %v4196_v6 }
  0x83   :  { %v95_v12 = vpop.permute.xlu1 %94  ;;  %v91_v13 = vpop.permute.xlu0 %90 }
  0x87   :  { %v97_v15 = vpop.permute.xlu1 %96  ;;  %v49_v16 = vpop.permute.xlu0 %48 }
  0x88   :  { %v99_v17 = vsel %vm98_vm0, %v95_v12, %v97_v15  ;;  %v102_v32 = vsel %vm98_vm0, %v97_v15, %v91_v13 }
  0x89   :  { %v129_v18 = vmul.f32 %v4084_v14, %v99_v17  ;;  %v126_v46 = vmul.f32 %v4113_v29, %v102_v32 }
  0x8b   :  { %3732 = vmatprep.subr.msk.mxu1 %vm136_vm1, %v129_v18  ;;  %v53_v22 = vpop.permute.xlu0 %52  ;;  %v51_v24 = vpop.permute.xlu1 %50 }
  0x8c   :  { %v61_v37 = vsel %vm58_vm2, %v49_v16, %v51_v24  ;;  %v60_v41 = vsel %vm58_vm2, %v51_v24, %v53_v22 }
  0x8d   :  { %v86_v50 = vmul.f32 %v4116_v30, %v61_v37  ;;  %v87_v55 = vmul.f32 %v4119_v31, %v60_v41 }
  0x8f   :  { %v55_v34 = vpop.permute.xlu1 %54  ;;  %v93_v35 = vpop.permute.xlu0 %92 }
  0x90   :  { %v59_v38 = vsel %vm58_vm2, %v53_v22, %v55_v34  ;;  %v100_v39 = vsel %vm98_vm0, %v93_v35, %v95_v12  ;;  %v101_v40 = vsel %vm98_vm0, %v91_v13, %v93_v35  ;;  %v62_v47 = vsel %vm58_vm2, %v55_v34, %v49_v16  ;;  %v3742_v22 = vld [vmem:[%s4688_s2 + $0x10] sm:$0xff] }
  0x91   :  { %v88_v42 = vmul.f32 %v4104_v26, %v59_v38  ;;  %v128_v43 = vmul.f32 %v4107_v27, %v100_v39  ;;  %v127_v44 = vmul.f32 %v4110_v28, %v101_v40  ;;  %v85_v59 = vmul.f32 %v4124_v33, %v62_v47 }
  0x92   :  { %v873_v16 = vcombine.low %v4173_v58, %v4180_v61  ;;  %v4231_v34 = vrot.slane %v3749_v57, %v4093_v21  ;;  %v4234_v35 = vrot.slane %v3749_v57, %v4077_v10  ;;  %v878_v40 = vmul.f32 %v874_v23, %v4017_v2  ;;  %v3758_v57 = vld [vmem:[%s4688_s2 + $0x20] sm:$0xff] }
  0x93   :  { %v451_v51 = vpop.permute.xlu1 %450  ;;  %3729 = vmatprep.subr.msk.mxu0 %vm136_vm1, %v127_v44  ;;  %3733 = vmatpush1.msk.msra.mxu1 %vm136_vm1, %v128_v43  ;;  %v449_v52 = vpop.permute.xlu0 %448 }
  0x94   :  { %v459_v56 = vsel %vm456_vm3, %v449_v52, %v451_v51  ;;  %3730 = vmatpush1.msk.msra.mxu0 %vm136_vm1, %v126_v46  ;;  %3738 = vmatprep.subr.msk.mxu1 %vm136_vm1, %v88_v42  ;;  %v877_v37 = vmul.f32 %v873_v16, %v4019_v3  ;;  %v3750_v46 = vld [vmem:[%s4688_s2 + $0x18] sm:$0xff]  ;;  %v3766_v16 = vld [vmem:[%s4688_s2 + $0x28] sm:$0xff] }
  0x95   :  { %v485_v60 = vmul.f32 %v4128_v36, %v459_v56  ;;  %3734 = vmatmul.mubr.msk.f32.vlgmr.msra.gmra.mxu1 %vm132_vm4, %v3728_v48  ;;  %3735 = vmatprep.subr.msk.mxu0 %vm136_vm1, %v86_v50 }
  0x96   :  { %3739 = vmatpush1.msk.msra.mxu1 %vm136_vm1, %v87_v55  ;;  %3731 = vmatmul.mubr.msk.f32.vlgmr.msra.gmra.mxu0 %vm132_vm4, %v3728_v48  ;;  %v883_v2 = vcombine.high %v877_v37, %v877_v37  ;;  %v3765_v48 = vld [vmem:[%s4687_s1 + $0x14] sm:$0xf] }
  0x97   :  { %3736 = vmatpush1.msk.msra.mxu0 %vm136_vm1, %v85_v59  ;;  %v455_v63 = vpop.permute.xlu1 %454  ;;  %v453_v0 = vpop.permute.xlu0 %452  ;;  %370 = vmatprep.mubr.f32.mxu0 %v4693_v5  ;;  %v4269_v55 = vrot.slane %v3765_v48, %v4091_v20  ;;  %v4272_v56 = vrot.slane %v3765_v48, %v4093_v21  ;;  %v4278_v59 = vrot.slane %v3765_v48, %v4089_v19 }
  0x98   :  { %v460_v7 = vsel %vm456_vm3, %v455_v63, %v449_v52  ;;  %3743 = vmatprep.subr.msk.mxu0 %vm136_vm1, %v485_v60  ;;  %v457_v8 = vsel %vm456_vm3, %v453_v0, %v455_v63  ;;  %v458_v11 = vsel %vm456_vm3, %v451_v51, %v453_v0  ;;  %441 = vmatprep.mubr.f32.mxu1 %v4693_v5 }
  0x99   :  { %v484_v12 = vmul.f32 %v4153_v49, %v460_v7  ;;  %v486_v13 = vmul.f32 %v4159_v53, %v458_v11  ;;  %v487_v15 = vmul.f32 %v4162_v54, %v457_v8  ;;  %3740 = vmatmul.mubr.msk.f32.vlgmr.msra.gmra.mxu1 %vm132_vm4, %v89_v62  ;;  %v884_v51 = vcombine.high %v878_v40, %v878_v40 }
  0x9a   :  { %3737 = vmatmul.mubr.msk.f32.vlgmr.msra.gmra.mxu0 %vm132_vm4, %v89_v62  ;;  %640 = vmatprep.mubr.f32.mxu1 %v4693_v5  ;;  %v4264_v52 = vrot.slane %v3765_v48, %v4077_v10  ;;  %v3781_v48 = vld [vmem:[%s4687_s1 + $0x1c] sm:$0xf] }
  0x9b   :  { %v654_v17 = vpop.permute.xlu1 %653  ;;  %3744 = vmatpush1.msk.msra.mxu0 %vm136_vm1, %v484_v12  ;;  %3746 = vmatprep.subr.msk.mxu1 %vm136_vm1, %v487_v15  ;;  %v652_v18 = vpop.permute.xlu0 %651 }
  0x9c   :  { %v662_v24 = vsel %vm659_vm5, %v652_v18, %v654_v17  ;;  %3747 = vmatpush1.msk.msra.mxu1 %vm136_vm1, %v486_v13  ;;  %569 = vmatprep.mubr.f32.mxu0 %v4693_v5  ;;  %4708 = vst [vmem:[#allocation8_spill] sm:$0xff] %v4264_v52 }
  0x9d   :  { %v688_v32 = vmul.f32 %v4190_v1, %v662_v24  ;;  %3748 = vmatmul.mubr.msk.f32.vlgmr.msra.gmra.mxu1 %vm132_vm4, %v3742_v22 }
  0x9e   :  { %3745 = vmatmul.mubr.msk.f32.vlgmr.msra.gmra.mxu0 %vm132_vm4, %v3742_v22  ;;  %843 = vmatprep.mubr.f32.mxu1 %v4693_v5 }
  0x9f   :  { %v658_v38 = vpop.permute.xlu1 %657  ;;  %3751 = vmatprep.subr.msk.mxu0 %vm136_vm1, %v688_v32  ;;  %v656_v39 = vpop.permute.xlu0 %655  ;;  %772 = vmatprep.mubr.f32.mxu0 %v4693_v5 }
  0xa0   :  { %v663_v41 = vsel %vm659_vm5, %v658_v38, %v652_v18  ;;  %v660_v42 = vsel %vm659_vm5, %v656_v39, %v658_v38  ;;  %v661_v3 = vsel %vm659_vm5, %v654_v17, %v656_v39  ;;  %v3773_v18 = vld [vmem:[%s4687_s1 + $0x18] sm:$0xf] }
  0xa1   :  { %v687_v43 = vmul.f32 %v4226_v25, %v663_v41  ;;  %v689_v44 = vmul.f32 %v4231_v34, %v661_v3  ;;  %v690_v45 = vmul.f32 %v4234_v35, %v660_v42  ;;  %v4314_v23 = vrot.slane %v3773_v18, %v4077_v10 }
  0xa2   :  { %v4318_v24 = vrot.slane %v3773_v18, %v4091_v20  ;;  %v4321_v32 = vrot.slane %v3773_v18, %v4093_v21 }
  0xa3   :  { %v1045_v47 = vpop.permute.xlu1 %1044  ;;  %3752 = vmatpush1.msk.msra.mxu0 %vm136_vm1, %v687_v43  ;;  %3754 = vmatprep.subr.msk.mxu1 %vm136_vm1, %v690_v45  ;;  %v1043_v50 = vpop.permute.xlu0 %1042  ;;  %4709 = vst [vmem:[#allocation9_spill] sm:$0xff] %v4314_v23 }
  0xa4   :  { %3755 = vmatpush1.msk.msra.mxu1 %vm136_vm1, %v689_v44  ;;  %3753 = vmatmul.mubr.msk.f32.vlgmr.msra.gmra.mxu0 %vm132_vm4, %v3750_v46  ;;  %v1053_v60 = vsel %vm1050_vm6, %v1043_v50, %v1045_v47  ;;  %4710 = vst [vmem:[#allocation10_spill] sm:$0xff] %v4318_v24  ;;  %4711 = vst [vmem:[#allocation11_spill] sm:$0xff] %v4321_v32 }
  0xa5   :  { %3756 = vmatmul.mubr.msk.f32.vlgmr.msra.gmra.mxu1 %vm132_vm4, %v3750_v46  ;;  %3759 = vmatprep.subr.msk.mxu0 %vm136_vm1, %v883_v2  ;;  %v1078_v15 = vmul.f32 %v4278_v59, %v1053_v60  ;;  %v3774_v2 = vld [vmem:[%s4688_s2 + $0x30] sm:$0xff]  ;;  %v4360_v60 = vrot.slane %v3781_v48, %v4093_v21 }
  0xa6   :  { %3760 = vmatpush1.msk.msra.mxu0 %vm136_vm1, %v877_v37  ;;  %960 = vmatprep.mubr.f32.mxu0 %v4693_v5  ;;  %v4324_v37 = vrot.slane %v3773_v18, %v4089_v19  ;;  %v3782_v18 = vld [vmem:[%s4688_s2 + $0x38] sm:$0xff] }
  0xa7   :  { %v1049_v62 = vpop.permute.xlu1 %1048  ;;  %v1047_v63 = vpop.permute.xlu0 %1046  ;;  %3762 = vmatprep.subr.msk.mxu1 %vm136_vm1, %v884_v51  ;;  %1031 = vmatprep.mubr.f32.mxu1 %v4693_v5  ;;  %v4354_v51 = vrot.slane %v3781_v48, %v4077_v10  ;;  %4715 = vst [vmem:[#allocation15_spill] sm:$0xff] %v4360_v60 }
  0xa8   :  { %v1054_v0 = vsel %vm1050_vm6, %v1049_v62, %v1043_v50  ;;  %v1051_v7 = vsel %vm1050_vm6, %v1047_v63, %v1049_v62  ;;  %v1052_v8 = vsel %vm1050_vm6, %v1045_v47, %v1047_v63  ;;  %3761 = vmatmul.mubr.msk.f32.vlgmr.msra.gmra.mxu0 %vm132_vm4, %v3758_v57  ;;  %3763 = vmatpush1.msk.msra.mxu1 %vm136_vm1, %v878_v40 }
  0xa9   :  { %v1081_v11 = vmul.f32 %v4264_v52, %v1054_v0  ;;  %v1079_v12 = vmul.f32 %v4269_v55, %v1052_v8  ;;  %v1080_v13 = vmul.f32 %v4272_v56, %v1051_v7  ;;  %3764 = vmatmul.mubr.msk.f32.vlgmr.msra.gmra.mxu1 %vm132_vm4, %v3758_v57  ;;  %1163 = vmatprep.mubr.f32.mxu0 %v4693_v5 }
  0xaa   :  { %1234 = vmatprep.mubr.f32.mxu1 %v4693_v5  ;;  %4712 = vst [vmem:[#allocation12_spill] sm:$0xff] %v4324_v37  ;;  %4713 = vst [vmem:[#allocation13_spill] sm:$0xff] %v4354_v51  ;;  %v4357_v57 = vrot.slane %v3781_v48, %v4091_v20  ;;  %v4363_v62 = vrot.slane %v3781_v48, %v4089_v19  ;;  %v3790_v48 = vld [vmem:[%s4688_s2 + $0x40] sm:$0xff] }
  0xab   :  { %v1248_v17 = vpop.permute.xlu1 %1247  ;;  %3767 = vmatprep.subr.msk.mxu0 %vm136_vm1, %v1079_v12  ;;  %3770 = vmatprep.subr.msk.mxu1 %vm136_vm1, %v1081_v11  ;;  %v1246_v22 = vpop.permute.xlu0 %1245 }
  0xac   :  { %3768 = vmatpush1.msk.msra.mxu0 %vm136_vm1, %v1078_v15  ;;  %3771 = vmatpush1.msk.msra.mxu1 %vm136_vm1, %v1080_v13  ;;  %v1256_v38 = vsel %vm1253_vm7, %v1246_v22, %v1248_v17  ;;  %4714 = vst [vmem:[#allocation14_spill] sm:$0xff] %v4357_v57  ;;  %4716 = vst [vmem:[#allocation16_spill] sm:$0xff] %v4363_v62 }
  0xad   :  { %3769 = vmatmul.mubr.msk.f32.vlgmr.msra.gmra.mxu0 %vm132_vm4, %v3766_v16  ;;  %3772 = vmatmul.mubr.msk.f32.vlgmr.msra.gmra.mxu1 %vm132_vm4, %v3766_v16  ;;  %v1281_v46 = vmul.f32 %v4324_v37, %v1256_v38  ;;  %v3789_v38 = vld [vmem:[%s4687_s1 + $0x20] sm:$0xf] }
  0xae   :  { %1366 = vmatprep.mubr.f32.mxu0 %v4693_v5  ;;  %1437 = vmatprep.mubr.f32.mxu1 %v4693_v5 }
  0xaf   :  { %v1252_v39 = vpop.permute.xlu1 %1251  ;;  %v1250_v40 = vpop.permute.xlu0 %1249 }
  0xb0   :  { %v1257_v41 = vsel %vm1253_vm7, %v1252_v39, %v1246_v22  ;;  %v1254_v42 = vsel %vm1253_vm7, %v1250_v40, %v1252_v39  ;;  %v1255_v3 = vsel %vm1253_vm7, %v1248_v17, %v1250_v40  ;;  %v4393_v40 = vrot.slane %v3789_v38, %v4077_v10 }
  0xb1   :  { %v1284_v43 = vmul.f32 %v4314_v23, %v1257_v41  ;;  %v1282_v44 = vmul.f32 %v4318_v24, %v1255_v3  ;;  %v1283_v45 = vmul.f32 %v4321_v32, %v1254_v42  ;;  %v4396_v41 = vrot.slane %v3789_v38, %v4091_v20 }
  0xb2   :  { %4717 = vst [vmem:[#allocation17_spill] sm:$0xff] %v4393_v40  ;;  %v4399_v42 = vrot.slane %v3789_v38, %v4093_v21  ;;  %v4402_v3 = vrot.slane %v3789_v38, %v4089_v19 }
  0xb3   :  { %v1451_v47 = vpop.permute.xlu1 %1450  ;;  %3775 = vmatprep.subr.msk.mxu0 %vm136_vm1, %v1282_v44  ;;  %3778 = vmatprep.subr.msk.mxu1 %vm136_vm1, %v1284_v43  ;;  %v1449_v50 = vpop.permute.xlu0 %1448  ;;  %4718 = vst [vmem:[#allocation18_spill] sm:$0xff] %v4396_v41 }
  0xb4   :  { %3776 = vmatpush1.msk.msra.mxu0 %vm136_vm1, %v1281_v46  ;;  %3779 = vmatpush1.msk.msra.mxu1 %vm136_vm1, %v1283_v45  ;;  %v1459_v63 = vsel %vm1456_vm8, %v1449_v50, %v1451_v47  ;;  %4719 = vst [vmem:[#allocation19_spill] sm:$0xff] %v4399_v42  ;;  %4720 = vst [vmem:[#allocation20_spill] sm:$0xff] %v4402_v3 }
  0xb5   :  { %3777 = vmatmul.mubr.msk.f32.vlgmr.msra.gmra.mxu0 %vm132_vm4, %v3774_v2  ;;  %3780 = vmatmul.mubr.msk.f32.vlgmr.msra.gmra.mxu1 %vm132_vm4, %v3774_v2  ;;  %v1484_v17 = vmul.f32 %v4363_v62, %v1459_v63 }
  0xb6   :  { %1569 = vmatprep.mubr.f32.mxu0 %v4693_v5  ;;  %1640 = vmatprep.mubr.f32.mxu1 %v4693_v5 }
  0xb7   :  { %v1455_v0 = vpop.permute.xlu1 %1454  ;;  %v1453_v7 = vpop.permute.xlu0 %1452 }
  0xb8   :  { %v1460_v8 = vsel %vm1456_vm8, %v1455_v0, %v1449_v50  ;;  %v1457_v11 = vsel %vm1456_vm8, %v1453_v7, %v1455_v0  ;;  %v1458_v12 = vsel %vm1456_vm8, %v1451_v47, %v1453_v7 }
  0xb9   :  { %v1487_v13 = vmul.f32 %v4354_v51, %v1460_v8  ;;  %v1485_v15 = vmul.f32 %v4357_v57, %v1458_v12  ;;  %v1486_v16 = vmul.f32 %v4360_v60, %v1457_v11 }
  0xbb   :  { %v1654_v22 = vpop.permute.xlu1 %1653  ;;  %3783 = vmatprep.subr.msk.mxu0 %vm136_vm1, %v1485_v15  ;;  %3786 = vmatprep.subr.msk.mxu1 %vm136_vm1, %v1487_v13  ;;  %v1652_v39 = vpop.permute.xlu0 %1651 }
  0xbc   :  { %3784 = vmatpush1.msk.msra.mxu0 %vm136_vm1, %v1484_v17  ;;  %3787 = vmatpush1.msk.msra.mxu1 %vm136_vm1, %v1486_v16  ;;  %v1662_v43 = vsel %vm1659_vm9, %v1652_v39, %v1654_v22 }
  0xbd   :  { %3785 = vmatmul.mubr.msk.f32.vlgmr.msra.gmra.mxu0 %vm132_vm4, %v3782_v18  ;;  %3788 = vmatmul.mubr.msk.f32.vlgmr.msra.gmra.mxu1 %vm132_vm4, %v3782_v18  ;;  %v1687_v47 = vmul.f32 %v4402_v3, %v1662_v43 }
  0xbe   :  { %1772 = vmatprep.mubr.f32.mxu0 %v4693_v5  ;;  %1843 = vmatprep.mubr.f32.mxu1 %v4693_v5 }
  0xbf   :  { %v1658_v44 = vpop.permute.xlu1 %1657  ;;  %v1656_v45 = vpop.permute.xlu0 %1655 }
  0xc0   :  { %v1663_v10 = vsel %vm1659_vm9, %v1658_v44, %v1652_v39  ;;  %v1660_v20 = vsel %vm1659_vm9, %v1656_v45, %v1658_v44  ;;  %v1661_v21 = vsel %vm1659_vm9, %v1654_v22, %v1656_v45 }
  0xc1   :  { %v1690_v19 = vmul.f32 %v4393_v40, %v1663_v10  ;;  %v1688_v46 = vmul.f32 %v4396_v41, %v1661_v21  ;;  %v1689_v2 = vmul.f32 %v4399_v42, %v1660_v20 }
  0xc3   :  { %3791 = vmatprep.subr.msk.mxu0 %vm136_vm1, %v1688_v46  ;;  %3794 = vmatprep.subr.msk.mxu1 %vm136_vm1, %v1690_v19 }
  0xc4   :  { %3792 = vmatpush1.msk.msra.mxu0 %vm136_vm1, %v1687_v47  ;;  %3795 = vmatpush1.msk.msra.mxu1 %vm136_vm1, %v1689_v2 }
  0xc5   :  { %3793 = vmatmul.mubr.msk.f32.vlgmr.msra.gmra.mxu0 %vm132_vm4, %v3790_v48  ;;  %3796 = vmatmul.mubr.msk.f32.vlgmr.msra.gmra.mxu1 %vm132_vm4, %v3790_v48 }
  0xc6   :  { %1961 = vmatprep.mubr.f32.mxu0 %v4693_v5  ;;  %2032 = vmatprep.mubr.f32.mxu1 %v4693_v5 }
 0x155   :  { %v286_v50 = vpop.f32.mrf.mxu1 }
 0x156   :  { %v215_v63 = vpop.f32.mrf.mxu0 }
 0x157   :  { %v288_v0 = vpop.f32.mrf.mxu1 }
 0x158   :  { %v217_v7 = vpop.f32.mrf.mxu0 }
 0x159   :  { %v443_v8 = vpop.f32.mrf.mxu1 }
 0x15a   :  { %v372_v11 = vpop.f32.mrf.mxu0  ;;  %v444_v19 = vadd.f32 %v443_v8, %v286_v50 }
 0x15b   :  { %v445_v12 = vpop.f32.mrf.mxu1  ;;  %v373_v21 = vadd.f32 %v372_v11, %v215_v63 }
 0x15c   :  { %v374_v13 = vpop.f32.mrf.mxu0  ;;  %v446_v48 = vadd.f32 %v445_v12, %v288_v0 }
 0x15d   :  { %v642_v15 = vpop.f32.mrf.mxu1  ;;  %v375_v47 = vadd.f32 %v374_v13, %v217_v7 }
 0x15e   :  { %v571_v16 = vpop.f32.mrf.mxu0  ;;  %v649_v40 = vadd.f32 %v642_v15, %v444_v19 }
 0x15f   :  { %v644_v18 = vpop.f32.mrf.mxu1  ;;  %v647_v5 = vadd.f32 %v571_v16, %v373_v21 }
 0x160   :  { %v573_v17 = vpop.f32.mrf.mxu0  ;;  %v650_v51 = vadd.f32 %v644_v18, %v446_v48 }
 0x161   :  { %v648_v41 = vadd.f32 %v573_v17, %v375_v47 }
 0x164   :  { %v774_v22 = vpop.f32.mrf.mxu0 }
 0x165   :  { %v845_v38 = vpop.f32.mrf.mxu1  ;;  %v850_v60 = vadd.f32 %v774_v22, %v647_v5 }
 0x166   :  { %v776_v39 = vpop.f32.mrf.mxu0  ;;  %v852_v23 = vadd.f32 %v845_v38, %v649_v40 }
 0x167   :  { %v847_v43 = vpop.f32.mrf.mxu1  ;;  %v851_v32 = vadd.f32 %v776_v39, %v648_v41 }
 0x168   :  { %v962_v44 = vpop.f32.mrf.mxu0  ;;  %v853_v37 = vadd.f32 %v847_v43, %v650_v51 }
 0x169   :  { %v1033_v45 = vpop.f32.mrf.mxu1  ;;  %v1038_v24 = vadd.f32 %v962_v44, %v850_v60 }
 0x16a   :  { %v964_v10 = vpop.f32.mrf.mxu0  ;;  %v1040_v50 = vadd.f32 %v1033_v45, %v852_v23 }
 0x16b   :  { %v1035_v20 = vpop.f32.mrf.mxu1  ;;  %v1039_v7 = vadd.f32 %v964_v10, %v851_v32 }
 0x16c   :  { %v1041_v0 = vadd.f32 %v1035_v20, %v853_v37 }
 0x16d   :  { %v1165_v46 = vpop.f32.mrf.mxu0  ;;  %v1236_v2 = vpop.f32.mrf.mxu1 }
 0x16e   :  { %v1241_v12 = vadd.f32 %v1165_v46, %v1038_v24  ;;  %v1243_v15 = vadd.f32 %v1236_v2, %v1040_v50 }
 0x16f   :  { %v1167_v42 = vpop.f32.mrf.mxu0  ;;  %v1238_v3 = vpop.f32.mrf.mxu1 }
 0x170   :  { %v1242_v13 = vadd.f32 %v1167_v42, %v1039_v7  ;;  %v1244_v5 = vadd.f32 %v1238_v3, %v1041_v0 }
 0x175   :  { %v1368_v62 = vpop.f32.mrf.mxu0  ;;  %v1439_v57 = vpop.f32.mrf.mxu1 }
 0x176   :  { %v1444_v16 = vadd.f32 %v1368_v62, %v1241_v12  ;;  %v1446_v22 = vadd.f32 %v1439_v57, %v1243_v15 }
 0x177   :  { %v1370_v52 = vpop.f32.mrf.mxu0  ;;  %v1441_v63 = vpop.f32.mrf.mxu1 }
 0x178   :  { %v1445_v21 = vadd.f32 %v1370_v52, %v1242_v13  ;;  %v1447_v60 = vadd.f32 %v1441_v63, %v1244_v5  ;;  %v4721_v13 = vmov 0.0  }
 0x17d   :  { %v1571_v8 = vpop.f32.mrf.mxu0  ;;  %v1642_v11 = vpop.f32.mrf.mxu1 }
 0x17e   :  { %v1647_v40 = vadd.f32 %v1571_v8, %v1444_v16  ;;  %v1649_v38 = vadd.f32 %v1642_v11, %v1446_v22  ;;  %v1874_v22 = vld [vmem:[%s4689_s3] sm:$0xff] }
 0x17f   :  { %v1573_v17 = vpop.f32.mrf.mxu0  ;;  %v1644_v18 = vpop.f32.mrf.mxu1 }
 0x180   :  { %v1648_v39 = vadd.f32 %v1573_v17, %v1445_v21  ;;  %v1650_v32 = vadd.f32 %v1644_v18, %v1447_v60 }
 0x185   :  { %v1774_v41 = vpop.f32.mrf.mxu0  ;;  %v1845_v51 = vpop.f32.mrf.mxu1 }
 0x186   :  { %v1850_v23 = vadd.f32 %v1774_v41, %v1647_v40  ;;  %v1852_v24 = vadd.f32 %v1845_v51, %v1649_v38 }
 0x187   :  { %v1776_v43 = vpop.f32.mrf.mxu0  ;;  %v1847_v44 = vpop.f32.mrf.mxu1 }
 0x188   :  { %v4429_v37 = vmax.f32 %v1850_v23, 0.0  ;;  %v1851_v42 = vadd.f32 %v1776_v43, %v1648_v39  ;;  %v1853_v45 = vadd.f32 %v1847_v44, %v1650_v32  ;;  %v4435_v52 = vmax.f32 %v1852_v24, 0.0  ;;  %v3802_v43 = vld [vmem:[%s4689_s3 + $0x10] sm:$0xff] }
 0x18a   :  { %v4431_v62 = vmax.f32 %v1851_v42, 0.0  ;;  %1875 = vrot.lane.b32.xlu0 %v4429_v37, %s3963_s8  ;;  %v4439_v57 = vmax.f32 %v1853_v45, 0.0 }
 0x18c   :  { %1877 = vrot.lane.b32.xlu1 %v4431_v62, %s3963_s8 }
 0x18e   :  { %1879 = vrot.lane.b32.xlu0 %v4435_v52, %s3963_s8 }
 0x190   :  { %1881 = vrot.lane.b32.xlu1 %v4439_v57, %s3963_s8 }
 0x192   :  { %1858 = vrot.lane.b32.xlu0 %v4429_v37, %s3965_s5 }
 0x194   :  { %1860 = vrot.lane.b32.xlu1 %v4431_v62, %s3965_s5 }
 0x196   :  { %1862 = vrot.lane.b32.xlu0 %v4435_v52, %s3965_s5 }
 0x198   :  { %1864 = vrot.lane.b32.xlu1 %v4439_v57, %s3965_s5 }
 0x19a   :  { %2184 = vrot.lane.b32.xlu0 %v4429_v37, %s3966_s9 }
 0x19c   :  { %2186 = vrot.lane.b32.xlu1 %v4431_v62, %s3966_s9 }
 0x19e   :  { %2188 = vrot.lane.b32.xlu0 %v4435_v52, %s3966_s9 }
 0x1a0   :  { %2190 = vrot.lane.b32.xlu1 %v4439_v57, %s3966_s9 }
 0x1a2   :  { %2351 = vrot.lane.b32.xlu0 %v4429_v37, %s3967_s10 }
 0x1a4   :  { %2353 = vrot.lane.b32.xlu1 %v4431_v62, %s3967_s10 }
 0x1a6   :  { %2355 = vrot.lane.b32.xlu0 %v4435_v52, %s3967_s10 }
 0x1a8   :  { %2357 = vrot.lane.b32.xlu1 %v4439_v57, %s3967_s10 }
 0x1aa   :  { %2677 = vrot.lane.b32.xlu0 %v4429_v37, %s3968_s11 }
 0x1ac   :  { %2679 = vrot.lane.b32.xlu1 %v4431_v62, %s3968_s11 }
 0x1ae   :  { %2681 = vrot.lane.b32.xlu0 %v4435_v52, %s3968_s11 }
 0x1b0   :  { %2683 = vrot.lane.b32.xlu1 %v4439_v57, %s3968_s11 }
 0x1b2   :  { %2844 = vrot.lane.b32.xlu0 %v4429_v37, %s3969_s12 }
 0x1b4   :  { %2846 = vrot.lane.b32.xlu1 %v4431_v62, %s3969_s12 }
 0x1b6   :  { %2848 = vrot.lane.b32.xlu0 %v4435_v52, %s3969_s12 }
 0x1b8   :  { %2850 = vrot.lane.b32.xlu1 %v4439_v57, %s3969_s12 }
 0x1ba   :  { %3011 = vrot.lane.b32.xlu0 %v4429_v37, %s3970_s13 }
 0x1bc   :  { %3013 = vrot.lane.b32.xlu1 %v4431_v62, %s3970_s13 }
 0x1be   :  { %3015 = vrot.lane.b32.xlu0 %v4435_v52, %s3970_s13 }
 0x1c0   :  { %3017 = vrot.lane.b32.xlu1 %v4439_v57, %s3970_s13 }
 0x1c2   :  { %3178 = vrot.lane.b32.xlu0 %v4429_v37, %s3971_s14 }
 0x1c4   :  { %3180 = vrot.lane.b32.xlu1 %v4431_v62, %s3971_s14 }
 0x1c6   :  { %3182 = vrot.lane.b32.xlu0 %v4435_v52, %s3971_s14 }
 0x1c8   :  { %3184 = vrot.lane.b32.xlu1 %v4439_v57, %s3971_s14 }
 0x1fc   :  { %v1876_v3 = vpop.permute.xlu0 %1875 }
 0x1fe   :  { %v1878_v10 = vpop.permute.xlu1 %1877 }
 0x1ff   :  { %v1885_v20 = vsel %vm98_vm0, %v1876_v3, %v1878_v10 }
 0x200   :  { %v1888_v19 = vmul.f32 %v1885_v20, %v4110_v28  ;;  %v1880_v46 = vpop.permute.xlu0 %1879  ;;  %v3797_v28 = vld [vmem:[%s4689_s3 + $0x8] sm:$0xff] }
 0x201   :  { %v1884_v2 = vsel %vm98_vm0, %v1878_v10, %v1880_v46 }
 0x202   :  { %1927 = vmatprep.subr.mxu0 %v1888_v19  ;;  %v1882_v47 = vpop.permute.xlu1 %1881  ;;  %v1889_v7 = vmul.f32 %v1884_v2, %v4107_v27  ;;  %v3805_v2 = vld [vmem:[%s4689_s3 + $0x18] sm:$0xff] }
 0x203   :  { %v1883_v48 = vsel %vm98_vm0, %v1880_v46, %v1882_v47  ;;  %v1886_v63 = vsel %vm98_vm0, %v1882_v47, %v1876_v3  ;;  %v2523_v46 = vmul.f32 %v4431_v62, %v4180_v61  ;;  %v2524_v61 = vmul.f32 %v4435_v52, %v4193_v4 }
 0x204   :  { %v1887_v50 = vmul.f32 %v1886_v63, %v4113_v29  ;;  %v1890_v8 = vmul.f32 %v1883_v48, %v4084_v14  ;;  %v1859_v11 = vpop.permute.xlu0 %1858  ;;  %v2525_v48 = vmul.f32 %v4439_v57, %v4196_v6 }
 0x206   :  { %1928 = vmatpush1.msra.mxu0 %v1887_v50  ;;  %1998 = vmatprep.subr.mxu1 %v1890_v8  ;;  %v1861_v0 = vpop.permute.xlu1 %1860  ;;  %v4722_v50 = vld [vmem:[#allocation8_spill] sm:$0xff] }
 0x207   :  { %v1868_v12 = vsel %vm58_vm2, %v1859_v11, %v1861_v0  ;;  %1999 = vmatpush1.msra.mxu1 %v1889_v7  ;;  %3798 = vmatmul.mubr.msk.f32.vlgmr.msra.gmra.mxu0 %vm1893_vm10, %v3797_v28 }
 0x208   :  { %v1871_v29 = vmul.f32 %v1868_v12, %v4116_v30  ;;  %v1863_v14 = vpop.permute.xlu0 %1862  ;;  %3799 = vmatmul.mubr.msk.f32.vlgmr.msra.gmra.mxu1 %vm1893_vm10, %v3797_v28  ;;  %2106 = vmatprep.mubr.f32.mxu0 %v4721_v13 }
 0x209   :  { %2177 = vmatprep.mubr.f32.mxu1 %v4721_v13  ;;  %v1867_v27 = vsel %vm58_vm2, %v1861_v0, %v1863_v14  ;;  %v4723_v0 = vld [vmem:[#allocation10_spill] sm:$0xff] }
 0x20a   :  { %2072 = vmatprep.subr.mxu0 %v1871_v29  ;;  %v1865_v15 = vpop.permute.xlu1 %1864  ;;  %v1872_v21 = vmul.f32 %v1867_v27, %v4119_v31 }
 0x20b   :  { %v1866_v16 = vsel %vm58_vm2, %v1863_v14, %v1865_v15  ;;  %v1869_v17 = vsel %vm58_vm2, %v1865_v15, %v1859_v11  ;;  %v4724_v14 = vld [vmem:[#allocation12_spill] sm:$0xff] }
 0x20c   :  { %v1870_v30 = vmul.f32 %v1869_v17, %v4124_v33  ;;  %v1873_v18 = vmul.f32 %v1866_v16, %v4104_v26  ;;  %v2185_v5 = vpop.permute.xlu0 %2184  ;;  %v3814_v17 = vld [vmem:[%s4689_s3 + $0x30] sm:$0xff] }
 0x20e   :  { %2073 = vmatpush1.msra.mxu0 %v1870_v30  ;;  %2143 = vmatprep.subr.mxu1 %v1873_v18  ;;  %v2187_v40 = vpop.permute.xlu1 %2186  ;;  %v4725_v30 = vld [vmem:[#allocation11_spill] sm:$0xff] }
 0x20f   :  { %v2194_v41 = vsel %vm456_vm3, %v2185_v5, %v2187_v40  ;;  %2144 = vmatpush1.msra.mxu1 %v1872_v21  ;;  %3800 = vmatmul.mubr.msk.f32.vlgmr.msra.gmra.mxu0 %vm1893_vm10, %v1874_v22 }
 0x210   :  { %v2197_v33 = vmul.f32 %v2194_v41, %v4128_v36  ;;  %v2189_v51 = vpop.permute.xlu0 %2188  ;;  %3801 = vmatmul.mubr.msk.f32.vlgmr.msra.gmra.mxu1 %vm1893_vm10, %v1874_v22  ;;  %2269 = vmatprep.mubr.f32.mxu0 %v4721_v13 }
 0x211   :  { %2340 = vmatprep.mubr.f32.mxu1 %v4721_v13  ;;  %v2193_v26 = vsel %vm456_vm3, %v2187_v40, %v2189_v51 }
 0x212   :  { %2235 = vmatprep.subr.mxu0 %v2197_v33  ;;  %v2191_v31 = vpop.permute.xlu1 %2190  ;;  %v2198_v44 = vmul.f32 %v2193_v26, %v4159_v53  ;;  %v4727_v26 = vld [vmem:[#allocation14_spill] sm:$0xff] }
 0x213   :  { %v2192_v60 = vsel %vm456_vm3, %v2189_v51, %v2191_v31  ;;  %v2195_v38 = vsel %vm456_vm3, %v2191_v31, %v2185_v5  ;;  %v4726_v5 = vld [vmem:[#allocation9_spill] sm:$0xff] }
 0x214   :  { %v2196_v36 = vmul.f32 %v2195_v38, %v4153_v49  ;;  %v2199_v39 = vmul.f32 %v2192_v60, %v4162_v54  ;;  %v2352_v23 = vpop.permute.xlu0 %2351  ;;  %v4728_v38 = vld [vmem:[#allocation16_spill] sm:$0xff] }
 0x216   :  { %2236 = vmatpush1.msra.mxu0 %v2196_v36  ;;  %2306 = vmatprep.subr.mxu1 %v2199_v39  ;;  %v2354_v32 = vpop.permute.xlu1 %2353 }
 0x217   :  { %v2361_v24 = vsel %vm659_vm5, %v2352_v23, %v2354_v32  ;;  %2307 = vmatpush1.msra.mxu1 %v2198_v44  ;;  %3803 = vmatmul.mubr.msk.f32.vlgmr.msra.gmra.mxu0 %vm1893_vm10, %v3802_v43  ;;  %v4729_v44 = vld [vmem:[#allocation15_spill] sm:$0xff] }
 0x218   :  { %v2364_v49 = vmul.f32 %v2361_v24, %v4190_v1  ;;  %v2356_v42 = vpop.permute.xlu0 %2355  ;;  %3804 = vmatmul.mubr.msk.f32.vlgmr.msra.gmra.mxu1 %vm1893_vm10, %v3802_v43  ;;  %2436 = vmatprep.mubr.f32.mxu0 %v4721_v13  ;;  %v3817_v43 = vld [vmem:[%s4689_s3 + $0x38] sm:$0xff]  ;;  %v4730_v24 = vld [vmem:[#allocation13_spill] sm:$0xff] }
 0x219   :  { %2507 = vmatprep.mubr.f32.mxu1 %v4721_v13  ;;  %v2360_v53 = vsel %vm659_vm5, %v2354_v32, %v2356_v42 }
 0x21a   :  { %2402 = vmatprep.subr.mxu0 %v2364_v49  ;;  %v2358_v54 = vpop.permute.xlu1 %2357  ;;  %v2365_v19 = vmul.f32 %v2360_v53, %v4231_v34 }
 0x21b   :  { %v2359_v45 = vsel %vm659_vm5, %v2356_v42, %v2358_v54  ;;  %v2362_v3 = vsel %vm659_vm5, %v2358_v54, %v2352_v23 }
 0x21c   :  { %v2363_v1 = vmul.f32 %v2362_v3, %v4226_v25  ;;  %v2366_v10 = vmul.f32 %v2359_v45, %v4234_v35  ;;  %v2678_v20 = vpop.permute.xlu0 %2677  ;;  %v2522_v25 = vmul.f32 %v4429_v37, %v4173_v58  ;;  %v3808_v58 = vld [vmem:[%s4689_s3 + $0x20] sm:$0xff] }
 0x21e   :  { %2403 = vmatpush1.msra.mxu0 %v2363_v1  ;;  %2473 = vmatprep.subr.mxu1 %v2366_v10  ;;  %v2680_v47 = vpop.permute.xlu1 %2679  ;;  %v4731_v1 = vld [vmem:[#allocation18_spill] sm:$0xff] }
 0x21f   :  { %2474 = vmatpush1.msra.mxu1 %v2365_v19  ;;  %2561 = vmatprep.subr.mxu0 %v2523_v46  ;;  %v2687_v34 = vsel %vm1050_vm6, %v2678_v20, %v2680_v47  ;;  %v4732_v19 = vld [vmem:[#allocation20_spill] sm:$0xff] }
 0x220   :  { %v2682_v35 = vpop.permute.xlu0 %2681  ;;  %3806 = vmatmul.mubr.msk.f32.vlgmr.msra.gmra.mxu0 %vm1893_vm10, %v3805_v2  ;;  %2632 = vmatprep.subr.mxu1 %v2525_v48  ;;  %v2689_v57 = vmul.f32 %v2687_v34, %v4278_v59  ;;  %v3820_v48 = vld [vmem:[%s4689_s3 + $0x40] sm:$0xff] }
 0x221   :  { %v2686_v62 = vsel %vm1050_vm6, %v2680_v47, %v2682_v35  ;;  %2562 = vmatpush1.msra.mxu0 %v2522_v25  ;;  %3807 = vmatmul.mubr.msk.f32.vlgmr.msra.gmra.mxu1 %vm1893_vm10, %v3805_v2  ;;  %v3914_v25 = vld [vmem:[%s4686_s0] sm:$0xff]  ;;  %s3972_s0 = smov [#allocation5]  }
 0x222   :  { %v2690_v6 = vmul.f32 %v2686_v62, %v4269_v55  ;;  %2633 = vmatpush1.msra.mxu1 %v2524_v61  ;;  %v2684_v37 = vpop.permute.xlu1 %2683  ;;  %2595 = vmatprep.mubr.f32.mxu0 %v4721_v13  ;;  %v3811_v55 = vld [vmem:[%s4689_s3 + $0x28] sm:$0xff]  ;;  %v3348_v34 = vcombine.high %v3914_v25, %v3914_v25  ;;  %v4734_v62 = vld [vmem:[#allocation17_spill] sm:$0xff] }
 0x223   :  { %v2685_v4 = vsel %vm1050_vm6, %v2682_v35, %v2684_v37  ;;  %v2688_v52 = vsel %vm1050_vm6, %v2684_v37, %v2678_v20  ;;  %2666 = vmatprep.mubr.f32.mxu1 %v4721_v13  ;;  %v4733_v35 = vld [vmem:[#allocation19_spill] sm:$0xff] }
 0x224   :  { %v2691_v63 = vmul.f32 %v2685_v4, %v4272_v56  ;;  %v2692_v8 = vmul.f32 %v2688_v52, %v4722_v50  ;;  %v2845_v11 = vpop.permute.xlu0 %2844  ;;  %2728 = vmatprep.subr.mxu0 %v2690_v6  ;;  %3809 = vmatmul.mubr.msk.f32.vlgmr.msra.gmra.mxu0 %vm1893_vm10, %v3808_v58  ;;  %v3349_v6 = vcombine.high %v3915_v9, %v3915_v9  ;;  %v3345_v37 = vld [vmem:[%s4690_s4] sm:$0xff]  ;;  %v3522_v4 = vld [vmem:[#allocation2 + $0x78] sm:$0xff]  ;;  %v3537_v52 = vld [vmem:[#allocation2 + $0xf0] sm:$0xff]  ;;  %s3718_s4 = sshll.u32 %s3972_s0, 4  ;;  %s3719_s4 = int_to_ptr.vmem [resolvable:$true] %s3718_s4 }
 0x225   :  { %3810 = vmatmul.mubr.msk.f32.vlgmr.msra.gmra.mxu1 %vm1893_vm10, %v3808_v58  ;;  %2729 = vmatpush1.msra.mxu0 %v2689_v57  ;;  %v3538_v57 = vld [vmem:[#allocation2 + $0xf8] sm:$0xff]  ;;  %v3521_v50 = vld [vmem:[#allocation2 + $0x70] sm:$0xff]  ;;  %s3936_s30 = scalar_lea.vmem %s3719_s4, 128  ;;  %p3941_p6 = scmp.lt.s32.totalorder %s3719_s4, %s3719_s4 }
 0x226   :  { %v2847_v59 = vpop.permute.xlu1 %2846  ;;  %2799 = vmatprep.subr.mxu1 %v2692_v8  ;;  %2762 = vmatprep.mubr.f32.mxu0 %v4721_v13  ;;  %v3554_v8 = vld [vmem:[#allocation2 + $0x178] sm:$0xff]  ;;  %p3937_p5 = scmp.ne.s32.totalorder %s3719_s4, %s3936_s30  ;;  %p3942_p7 = scmp.lt.s32.totalorder %s3936_s30, %s3936_s30 }
 0x227   :  { %2800 = vmatpush1.msra.mxu1 %v2691_v63  ;;  %2833 = vmatprep.mubr.f32.mxu1 %v4721_v13  ;;  %v2854_v56 = vsel %vm1253_vm7, %v2845_v11, %v2847_v59  ;;  %v3570_v63 = vld [vmem:[#allocation2 + $0x1f8] sm:$0xff] }
 0x228   :  { %v2849_v28 = vpop.permute.xlu0 %2848  ;;  %3812 = vmatmul.mubr.msk.f32.vlgmr.msra.gmra.mxu0 %vm1893_vm10, %v3811_v55  ;;  %v2856_v27 = vmul.f32 %v2854_v56, %v4724_v14  ;;  %v3535_v56 = vld [vmem:[#allocation2 + $0xe0] sm:$0xff]  ;;  %v3518_v14 = vld [vmem:[#allocation2 + $0x58] sm:$0xff]  ;;  %p3943_p8 = por %p3942_p7, %p3941_p6 }
 0x229   :  { %v2853_v7 = vsel %vm1253_vm7, %v2847_v59, %v2849_v28  ;;  %3813 = vmatmul.mubr.msk.f32.vlgmr.msra.gmra.mxu1 %vm1893_vm10, %v3811_v55  ;;  %2929 = vmatprep.mubr.f32.mxu0 %v4721_v13  ;;  %v3569_v55 = vld [vmem:[#allocation2 + $0x1f0] sm:$0xff]  ;;  %v3520_v59 = vld [vmem:[#allocation2 + $0x68] sm:$0xff] }
 0x22a   :  { %v2857_v12 = vmul.f32 %v2853_v7, %v4723_v0  ;;  %v2851_v29 = vpop.permute.xlu1 %2850  ;;  %3000 = vmatprep.mubr.f32.mxu1 %v4721_v13  ;;  %v3519_v7 = vld [vmem:[#allocation2 + $0x60] sm:$0xff]  ;;  %v3552_v0 = vld [vmem:[#allocation2 + $0x168] sm:$0xff]  ;;  %p3944_p9 = pnand %p3943_p8, %p3937_p5 }
 0x22b   :  { %v2852_v15 = vsel %vm1253_vm7, %v2849_v28, %v2851_v29  ;;  %v2855_v16 = vsel %vm1253_vm7, %v2851_v29, %v2845_v11  ;;  %v3536_v11 = vld [vmem:[#allocation2 + $0xe8] sm:$0xff]  ;;  %v3567_v29 = vld [vmem:[#allocation2 + $0x1e0] sm:$0xff] }
 0x22c   :  { %v2858_v18 = vmul.f32 %v2852_v15, %v4725_v30  ;;  %v2859_v22 = vmul.f32 %v2855_v16, %v4726_v5  ;;  %v3012_v21 = vpop.permute.xlu0 %3011  ;;  %2895 = vmatprep.subr.mxu0 %v2857_v12  ;;  %v3568_v28 = vld [vmem:[#allocation2 + $0x1e8] sm:$0xff]  ;;  %v3534_v12 = vld [vmem:[#allocation2 + $0xd8] sm:$0xff]  ;;  %v3533_v15 = vld [vmem:[#allocation2 + $0xd0] sm:$0xff] }
 0x22d   :  { %2896 = vmatpush1.msra.mxu0 %v2856_v27  ;;  %v3551_v27 = vld [vmem:[#allocation2 + $0x160] sm:$0xff]  ;;  %v3566_v16 = vld [vmem:[#allocation2 + $0x1d8] sm:$0xff]  ;;  %v3565_v5 = vld [vmem:[#allocation2 + $0x1d0] sm:$0xff] }
 0x22e   :  { %3815 = vmatmul.mubr.msk.f32.vlgmr.msra.gmra.mxu0 %vm1893_vm10, %v3814_v17  ;;  %v3014_v40 = vpop.permute.xlu1 %3013  ;;  %2966 = vmatprep.subr.mxu1 %v2859_v22  ;;  %v3550_v30 = vld [vmem:[#allocation2 + $0x158] sm:$0xff]  ;;  %v3516_v22 = vld [vmem:[#allocation2 + $0x48] sm:$0xff] }
 0x22f   :  { %2967 = vmatpush1.msra.mxu1 %v2858_v18  ;;  %3096 = vmatprep.mubr.f32.mxu0 %v4721_v13  ;;  %v3021_v41 = vsel %vm1456_vm8, %v3012_v21, %v3014_v40  ;;  %v3532_v18 = vld [vmem:[#allocation2 + $0xc8] sm:$0xff] }
 0x230   :  { %v3016_v33 = vpop.permute.xlu0 %3015  ;;  %3816 = vmatmul.mubr.msk.f32.vlgmr.msra.gmra.mxu1 %vm1893_vm10, %v3814_v17  ;;  %v3023_v36 = vmul.f32 %v3021_v41, %v4728_v38  ;;  %v3517_v17 = vld [vmem:[#allocation2 + $0x50] sm:$0xff]  ;;  %v3564_v41 = vld [vmem:[#allocation2 + $0x1c8] sm:$0xff]  ;;  %v3547_v38 = vld [vmem:[#allocation2 + $0x140] sm:$0xff] }
 0x231   :  { %v3020_v51 = vsel %vm1456_vm8, %v3014_v40, %v3016_v33  ;;  %3167 = vmatprep.mubr.f32.mxu1 %v4721_v13  ;;  %v3531_v40 = vld [vmem:[#allocation2 + $0xc0] sm:$0xff] }
 0x232   :  { %v3024_v31 = vmul.f32 %v3020_v51, %v4727_v26  ;;  %v3018_v60 = vpop.permute.xlu1 %3017  ;;  %v3548_v51 = vld [vmem:[#allocation2 + $0x148] sm:$0xff]  ;;  %v3530_v26 = vld [vmem:[#allocation2 + $0xb8] sm:$0xff] }
 0x233   :  { %v3019_v39 = vsel %vm1456_vm8, %v3016_v33, %v3018_v60  ;;  %v3022_v23 = vsel %vm1456_vm8, %v3018_v60, %v3012_v21  ;;  %v3549_v21 = vld [vmem:[#allocation2 + $0x150] sm:$0xff]  ;;  %v3515_v33 = vld [vmem:[#allocation2 + $0x40] sm:$0xff]  ;;  %v3514_v60 = vld [vmem:[#allocation2 + $0x38] sm:$0xff] }
 0x234   :  { %v3025_v32 = vmul.f32 %v3019_v39, %v4729_v44  ;;  %v3026_v49 = vmul.f32 %v3022_v23, %v4730_v24  ;;  %v3179_v42 = vpop.permute.xlu0 %3178  ;;  %3062 = vmatprep.subr.mxu0 %v3024_v31  ;;  %v3563_v31 = vld [vmem:[#allocation2 + $0x1c0] sm:$0xff]  ;;  %v3562_v39 = vld [vmem:[#allocation2 + $0x1b8] sm:$0xff]  ;;  %v3513_v23 = vld [vmem:[#allocation2 + $0x30] sm:$0xff] }
 0x235   :  { %3063 = vmatpush1.msra.mxu0 %v3023_v36  ;;  %v3529_v36 = vld [vmem:[#allocation2 + $0xb0] sm:$0xff]  ;;  %v3528_v44 = vld [vmem:[#allocation2 + $0xa8] sm:$0xff] }
 0x236   :  { %3818 = vmatmul.mubr.msk.f32.vlgmr.msra.gmra.mxu0 %vm1893_vm10, %v3817_v43  ;;  %v3181_v53 = vpop.permute.xlu1 %3180  ;;  %3133 = vmatprep.subr.mxu1 %v3026_v49  ;;  %v3512_v24 = vld [vmem:[#allocation2 + $0x28] sm:$0xff]  ;;  %v3545_v49 = vld [vmem:[#allocation2 + $0x130] sm:$0xff] }
 0x237   :  { %3134 = vmatpush1.msra.mxu1 %v3025_v32  ;;  %3263 = vmatprep.mubr.f32.mxu0 %v4721_v13  ;;  %v3188_v54 = vsel %vm1659_vm9, %v3179_v42, %v3181_v53  ;;  %v3561_v32 = vld [vmem:[#allocation2 + $0x1b0] sm:$0xff] }
 0x238   :  { %v3183_v45 = vpop.permute.xlu0 %3182  ;;  %3819 = vmatmul.mubr.msk.f32.vlgmr.msra.gmra.mxu1 %vm1893_vm10, %v3817_v43  ;;  %v3190_v46 = vmul.f32 %v3188_v54, %v4732_v19  ;;  %v3546_v43 = vld [vmem:[#allocation2 + $0x138] sm:$0xff]  ;;  %v3511_v54 = vld [vmem:[#allocation2 + $0x20] sm:$0xff]  ;;  %v3525_v19 = vld [vmem:[#allocation2 + $0x90] sm:$0xff] }
 0x239   :  { %v3187_v3 = vsel %vm1659_vm9, %v3181_v53, %v3183_v45  ;;  %3334 = vmatprep.mubr.f32.mxu1 %v4721_v13  ;;  %v3560_v53 = vld [vmem:[#allocation2 + $0x1a8] sm:$0xff] }
 0x23a   :  { %v3191_v10 = vmul.f32 %v3187_v3, %v4731_v1  ;;  %v3185_v20 = vpop.permute.xlu1 %3184  ;;  %v3526_v3 = vld [vmem:[#allocation2 + $0x98] sm:$0xff]  ;;  %v3559_v1 = vld [vmem:[#allocation2 + $0x1a0] sm:$0xff] }
 0x23b   :  { %v3186_v2 = vsel %vm1659_vm9, %v3183_v45, %v3185_v20  ;;  %v3189_v47 = vsel %vm1659_vm9, %v3185_v20, %v3179_v42  ;;  %v3527_v42 = vld [vmem:[#allocation2 + $0xa0] sm:$0xff]  ;;  %v3544_v45 = vld [vmem:[#allocation2 + $0x128] sm:$0xff] }
 0x23c   :  { %v3192_v61 = vmul.f32 %v3186_v2, %v4733_v35  ;;  %v3193_v58 = vmul.f32 %v3189_v47, %v4734_v62  ;;  %3229 = vmatprep.subr.mxu0 %v3191_v10  ;;  %v3510_v10 = vld [vmem:[#allocation2 + $0x18] sm:$0xff]  ;;  %v3543_v20 = vld [vmem:[#allocation2 + $0x120] sm:$0xff]  ;;  %v3509_v2 = vld [vmem:[#allocation2 + $0x10] sm:$0xff] }
 0x23d   :  { %3230 = vmatpush1.msra.mxu0 %v3190_v46  ;;  %v3558_v46 = vld [vmem:[#allocation2 + $0x198] sm:$0xff]  ;;  %v3541_v35 = vld [vmem:[#allocation2 + $0x110] sm:$0xff]  ;;  %v3556_v62 = vld [vmem:[#allocation2 + $0x188] sm:$0xff] }
 0x23e   :  { %3821 = vmatmul.mubr.msk.f32.vlgmr.msra.gmra.mxu0 %vm1893_vm10, %v3820_v48  ;;  %3300 = vmatprep.subr.mxu1 %v3193_v58  ;;  %v3542_v47 = vld [vmem:[#allocation2 + $0x118] sm:$0xff]  ;;  %v3507_v58 = vld [vmem:[#allocation2] sm:$0xff] }
 0x23f   :  { %3301 = vmatpush1.msra.mxu1 %v3192_v61  ;;  %3823 = vmatprep.subr.msk.mxu0 %vm136_vm1, %v3348_v34  ;;  %v3508_v34 = vld [vmem:[#allocation2 + $0x8] sm:$0xff]  ;;  %v3523_v61 = vld [vmem:[#allocation2 + $0x80] sm:$0xff] }
 0x240   :  { %3822 = vmatmul.mubr.msk.f32.vlgmr.msra.gmra.mxu1 %vm1893_vm10, %v3820_v48  ;;  %3824 = vmatpush1.msk.msra.mxu0 %vm136_vm1, %v3914_v25  ;;  %v3524_v48 = vld [vmem:[#allocation2 + $0x88] sm:$0xff]  ;;  %v3557_v25 = vld [vmem:[#allocation2 + $0x190] sm:$0xff] }
 0x241   :  { %3425 = vmatprep.mubr.f32.mxu0 %v4721_v13  ;;  %3826 = vmatprep.subr.msk.mxu1 %vm136_vm1, %v3349_v6  ;;  %v3555_v6 = vld [vmem:[#allocation2 + $0x180] sm:$0xff] }
 0x242   :  { %3825 = vmatmul.mubr.msk.f32.vlgmr.msra.gmra.mxu0 %vm132_vm4, %v3345_v37  ;;  %3827 = vmatpush1.msk.msra.mxu1 %vm136_vm1, %v3915_v9  ;;  %v3540_v9 = vld [vmem:[#allocation2 + $0x108] sm:$0xff] }
 0x243   :  { %3496 = vmatprep.mubr.f32.mxu1 %v4721_v13  ;;  %3829 = vmatprep.subr.mxu0 %v3538_v57  ;;  %v3553_v13 = vld [vmem:[#allocation2 + $0x170] sm:$0xff] }
 0x244   :  { %3828 = vmatmul.mubr.msk.f32.vlgmr.msra.gmra.mxu1 %vm132_vm4, %v3345_v37  ;;  %3830 = vmatpush3.msra.mxu0 %v3522_v4  ;;  %v3539_v37 = vld [vmem:[#allocation2 + $0x100] sm:$0xff] }
 0x245   :  { %3831 = vmatprep.subr.mxu0 %v3537_v52  ;;  %3864 = vmatprep.subr.mxu1 %v3570_v63 }
 0x246   :  { %3832 = vmatpush3.msra.mxu0 %v3521_v50  ;;  %3865 = vmatpush3.msra.mxu1 %v3554_v8 }
 0x247   :  { %3833 = vmatprep.subr.mxu0 %v3536_v11  ;;  %3866 = vmatprep.subr.mxu1 %v3569_v55 }
 0x248   :  { %3834 = vmatpush3.msra.mxu0 %v3520_v59  ;;  %3867 = vmatpush3.msra.mxu1 %v3553_v13 }
 0x249   :  { %3835 = vmatprep.subr.mxu0 %v3535_v56  ;;  %3868 = vmatprep.subr.mxu1 %v3568_v28 }
 0x24a   :  { %3836 = vmatpush3.msra.mxu0 %v3519_v7  ;;  %3869 = vmatpush3.msra.mxu1 %v3552_v0 }
 0x24b   :  { %3837 = vmatprep.subr.mxu0 %v3534_v12  ;;  %3870 = vmatprep.subr.mxu1 %v3567_v29 }
 0x24c   :  { %3838 = vmatpush3.msra.mxu0 %v3518_v14  ;;  %3871 = vmatpush3.msra.mxu1 %v3551_v27 }
 0x24d   :  { %3839 = vmatprep.subr.mxu0 %v3533_v15  ;;  %3872 = vmatprep.subr.mxu1 %v3566_v16 }
 0x24e   :  { %3840 = vmatpush3.msra.mxu0 %v3517_v17  ;;  %3873 = vmatpush3.msra.mxu1 %v3550_v30 }
 0x24f   :  { %3841 = vmatprep.subr.mxu0 %v3532_v18  ;;  %3874 = vmatprep.subr.mxu1 %v3565_v5 }
 0x250   :  { %3842 = vmatpush3.msra.mxu0 %v3516_v22  ;;  %3875 = vmatpush3.msra.mxu1 %v3549_v21 }
 0x251   :  { %3843 = vmatprep.subr.mxu0 %v3531_v40  ;;  %3876 = vmatprep.subr.mxu1 %v3564_v41 }
 0x252   :  { %3844 = vmatpush3.msra.mxu0 %v3515_v33  ;;  %3877 = vmatpush3.msra.mxu1 %v3548_v51 }
 0x253   :  { %3845 = vmatprep.subr.mxu0 %v3530_v26  ;;  %3878 = vmatprep.subr.mxu1 %v3563_v31 }
 0x254   :  { %3846 = vmatpush3.msra.mxu0 %v3514_v60  ;;  %3879 = vmatpush3.msra.mxu1 %v3547_v38 }
 0x255   :  { %3847 = vmatprep.subr.mxu0 %v3529_v36  ;;  %3880 = vmatprep.subr.mxu1 %v3562_v39 }
 0x256   :  { %3848 = vmatpush3.msra.mxu0 %v3513_v23  ;;  %3881 = vmatpush3.msra.mxu1 %v3546_v43 }
 0x257   :  { %3849 = vmatprep.subr.mxu0 %v3528_v44  ;;  %3882 = vmatprep.subr.mxu1 %v3561_v32 }
 0x258   :  { %3850 = vmatpush3.msra.mxu0 %v3512_v24  ;;  %3883 = vmatpush3.msra.mxu1 %v3545_v49 }
 0x259   :  { %3851 = vmatprep.subr.mxu0 %v3527_v42  ;;  %3884 = vmatprep.subr.mxu1 %v3560_v53 }
 0x25a   :  { %3852 = vmatpush3.msra.mxu0 %v3511_v54  ;;  %3885 = vmatpush3.msra.mxu1 %v3544_v45 }
 0x25b   :  { %3853 = vmatprep.subr.mxu0 %v3526_v3  ;;  %3886 = vmatprep.subr.mxu1 %v3559_v1 }
 0x25c   :  { %3854 = vmatpush3.msra.mxu0 %v3510_v10  ;;  %3887 = vmatpush3.msra.mxu1 %v3543_v20 }
 0x25d   :  { %3855 = vmatprep.subr.mxu0 %v3525_v19  ;;  %3888 = vmatprep.subr.mxu1 %v3558_v46 }
 0x25e   :  { %3856 = vmatpush3.msra.mxu0 %v3509_v2  ;;  %3889 = vmatpush3.msra.mxu1 %v3542_v47 }
 0x25f   :  { %3857 = vmatprep.subr.mxu0 %v3524_v48  ;;  %3890 = vmatprep.subr.mxu1 %v3557_v25 }
 0x260   :  { %3858 = vmatpush3.msra.mxu0 %v3508_v34  ;;  %3891 = vmatpush3.msra.mxu1 %v3541_v35 }
 0x261   :  { %3859 = vmatprep.subr.mxu0 %v3523_v61  ;;  %3892 = vmatprep.subr.mxu1 %v3556_v62 }
 0x262   :  { %3860 = vmatpush3.msra.mxu0 %v3507_v58  ;;  %3893 = vmatpush3.msra.mxu1 %v3540_v9 }
 0x263   :  { %3894 = vmatprep.subr.mxu1 %v3555_v6 }
 0x264   :  { %3895 = vmatpush3.msra.mxu1 %v3539_v37 }
 0x2c7   :  { %v1963_v57 = vpop.f32.mrf.mxu0 }
 0x2c8   :  { %v2034_v4 = vpop.f32.mrf.mxu1 }
 0x2c9   :  { %v1965_v52 = vpop.f32.mrf.mxu0 }
 0x2ca   :  { %v2036_v63 = vpop.f32.mrf.mxu1 }
 0x2cf   :  { %v2108_v50 = vpop.f32.mrf.mxu0 }
 0x2d0   :  { %v2179_v8 = vpop.f32.mrf.mxu1  ;;  %v2109_v18 = vadd.f32 %v2108_v50, %v1963_v57 }
 0x2d1   :  { %v2110_v11 = vpop.f32.mrf.mxu0  ;;  %v2180_v22 = vadd.f32 %v2179_v8, %v2034_v4 }
 0x2d2   :  { %v2181_v55 = vpop.f32.mrf.mxu1  ;;  %v2111_v30 = vadd.f32 %v2110_v11, %v1965_v52 }
 0x2d3   :  { %v2182_v40 = vadd.f32 %v2181_v55, %v2036_v63 }
 0x2d7   :  { %v2271_v59 = vpop.f32.mrf.mxu0 }
 0x2d8   :  { %v2342_v13 = vpop.f32.mrf.mxu1  ;;  %v2347_v33 = vadd.f32 %v2271_v59, %v2109_v18 }
 0x2d9   :  { %v2273_v56 = vpop.f32.mrf.mxu0  ;;  %v2349_v31 = vadd.f32 %v2342_v13, %v2180_v22 }
 0x2da   :  { %v2344_v28 = vpop.f32.mrf.mxu1  ;;  %v2348_v41 = vadd.f32 %v2273_v56, %v2111_v30 }
 0x2db   :  { %v2350_v38 = vadd.f32 %v2344_v28, %v2182_v40 }
 0x2e0   :  { %v2438_v7 = vpop.f32.mrf.mxu0 }
 0x2e1   :  { %v2509_v0 = vpop.f32.mrf.mxu1  ;;  %v2514_v39 = vadd.f32 %v2438_v7, %v2347_v33 }
 0x2e2   :  { %v2440_v12 = vpop.f32.mrf.mxu0  ;;  %v2516_v43 = vadd.f32 %v2509_v0, %v2349_v31 }
 0x2e3   :  { %v2511_v29 = vpop.f32.mrf.mxu1  ;;  %v2515_v36 = vadd.f32 %v2440_v12, %v2348_v41 }
 0x2e4   :  { %v2597_v14 = vpop.f32.mrf.mxu0  ;;  %v2517_v24 = vadd.f32 %v2511_v29, %v2350_v38 }
 0x2e5   :  { %v2668_v27 = vpop.f32.mrf.mxu1  ;;  %v2673_v42 = vadd.f32 %v2597_v14, %v2514_v39 }
 0x2e6   :  { %v2599_v15 = vpop.f32.mrf.mxu0  ;;  %v2675_v54 = vadd.f32 %v2668_v27, %v2516_v43 }
 0x2e7   :  { %v2670_v16 = vpop.f32.mrf.mxu1  ;;  %v2674_v49 = vadd.f32 %v2599_v15, %v2515_v36 }
 0x2e8   :  { %v2764_v17 = vpop.f32.mrf.mxu0  ;;  %v2676_v3 = vadd.f32 %v2670_v16, %v2517_v24 }
 0x2e9   :  { %v2835_v5 = vpop.f32.mrf.mxu1  ;;  %v2840_v10 = vadd.f32 %v2764_v17, %v2673_v42 }
 0x2ea   :  { %v2766_v21 = vpop.f32.mrf.mxu0  ;;  %v2842_v47 = vadd.f32 %v2835_v5, %v2675_v54 }
 0x2eb   :  { %v2837_v51 = vpop.f32.mrf.mxu1  ;;  %v2841_v1 = vadd.f32 %v2766_v21, %v2674_v49 }
 0x2ec   :  { %v2843_v46 = vadd.f32 %v2837_v51, %v2676_v3 }
 0x2ee   :  { %v2931_v26 = vpop.f32.mrf.mxu0 }
 0x2ef   :  { %v3007_v48 = vadd.f32 %v2931_v26, %v2840_v10 }
 0x2f0   :  { %v3002_v60 = vpop.f32.mrf.mxu1  ;;  %v2933_v23 = vpop.f32.mrf.mxu0 }
 0x2f1   :  { %v3008_v2 = vadd.f32 %v2933_v23, %v2841_v1  ;;  %v3009_v62 = vadd.f32 %v3002_v60, %v2842_v47 }
 0x2f2   :  { %v3004_v44 = vpop.f32.mrf.mxu1 }
 0x2f3   :  { %v3010_v35 = vadd.f32 %v3004_v44, %v2843_v46 }
 0x2f6   :  { %v3098_v32 = vpop.f32.mrf.mxu0 }
 0x2f7   :  { %v3174_v58 = vadd.f32 %v3098_v32, %v3007_v48 }
 0x2f8   :  { %v3169_v53 = vpop.f32.mrf.mxu1  ;;  %v3100_v45 = vpop.f32.mrf.mxu0 }
 0x2f9   :  { %v3175_v61 = vadd.f32 %v3100_v45, %v3008_v2  ;;  %v3176_v4 = vadd.f32 %v3169_v53, %v3009_v62 }
 0x2fa   :  { %v3171_v20 = vpop.f32.mrf.mxu1 }
 0x2fb   :  { %v3177_v37 = vadd.f32 %v3171_v20, %v3010_v35 }
 0x2fe   :  { %v3265_v19 = vpop.f32.mrf.mxu0 }
 0x2ff   :  { %v3341_v52 = vadd.f32 %v3265_v19, %v3174_v58 }
 0x300   :  { %v3267_v25 = vpop.f32.mrf.mxu0  ;;  %v3336_v34 = vpop.f32.mrf.mxu1 }
 0x301   :  { %v3342_v57 = vadd.f32 %v3267_v25, %v3175_v61  ;;  %v3343_v55 = vadd.f32 %v3336_v34, %v3176_v4 }
 0x302   :  { %v3338_v9 = vpop.f32.mrf.mxu1  ;;  %v3427_v6 = vpop.f32.mrf.mxu0 }
 0x303   :  { %v3344_v8 = vadd.f32 %v3338_v9, %v3177_v37  ;;  %v3503_v59 = vadd.f32 %v3427_v6, %v3341_v52 }
 0x304   :  { %v3429_v63 = vpop.f32.mrf.mxu0  ;;  %v3498_v50 = vpop.f32.mrf.mxu1 }
 0x305   :  { %v3504_v11 = vadd.f32 %v3429_v63, %v3342_v57  ;;  %v3505_v28 = vadd.f32 %v3498_v50, %v3343_v55 }
 0x306   :  { %v3500_v13 = vpop.f32.mrf.mxu1 }
 0x307   :  { %v3506_v56 = vadd.f32 %v3500_v13, %v3344_v8  ;;  %3635 = vmatprep.mubr.f32.mxu0 %v3504_v11 }
 0x308   :  { %3636 = vmatmul.mubr.f32.vlgmr.msra.gmra.mxu0 %v3503_v59 }
 0x309   :  { %3705 = vmatprep.mubr.f32.mxu1 %v3506_v56 }
 0x30a   :  { %3706 = vmatmul.mubr.f32.vlgmr.msra.gmra.mxu1 %v3505_v28 }
 0x3c8   :  { %v3861_v7 = vpop.f32.mrf.mxu0 }
 0x3ca   :  { %v3862_v0 = vpop.f32.mrf.mxu0  ;;  %v3896_v12 = vpop.f32.mrf.mxu1 }
 0x3cb   :  { %v3863_v14 = vadd.f32 %v3862_v0, %v3861_v7 }
 0x3cc   :  { %v3897_v29 = vpop.f32.mrf.mxu1 }
 0x3cd   :  { %v3898_v27 = vadd.f32 %v3897_v29, %v3896_v12 }
 0x3cf   :  { %v3708_v15 = vadd.f32 %v3898_v27, %v3863_v14 }
 0x3d1   :  { %3711 = vst [vmem:[#allocation5] sm:$0xff] %v3708_v15 }
 0x3d2   :  { %3947 = shalt.err (!%p3944_p9)
}
 0x3d3   :  { %3721 = dma.vmem_to_hbm [thread:$0]  %s3719_s4, 128, %s4692_s6, [#allocation4]  }
 0x3d4   :  { %3958 = dma.done.wait [#allocation4], 128  }
 0x3d5   :  { %3959 = vsyncadd [#allocation4], 4294967168 }
 0x3d6   :  { %3725 = vsyncpa [#allocation3], 1 }
 0x3d7   :  { %3726 = vsyncpa [#allocation4], 1 }

</bundles_post_ra>
